<compile_context>
chip_gen: v7x
topology: tpu7x:2x2x1
jax: 0.10.0
libtpu: 0.0.40
codegen_flags: <defaults>
</compile_context>

<pallas_src>
import numpy as np
import jax
import jax.numpy as jnp
from jax.experimental import pallas as pl
from jax.experimental.pallas import tpu as pltpu


_PAD = 128                          # lane alignment for padded position axes
_VMEM_LIMIT = 32 * 1024 * 1024      # explicit scoped-VMEM budget (safe on v5e..v7x)


def _spec(shape):
    """Full-array BlockSpec for a single-step grid."""
    zeros = (0,) * len(shape)
    return pl.BlockSpec(shape, lambda i: zeros)


def _cparams():
    return pltpu.CompilerParams(dimension_semantics=("arbitrary",),
                                vmem_limit_bytes=_VMEM_LIMIT)


# ----------------------------- Pallas kernels ------------------------------ #

def _conv_relu_kernel(x_ref, w_ref, b_ref, o_ref):
    # x_ref: (K, P) f32 im2col slab   w_ref: (Cout, K)   b_ref: (Cout, 1)
    # o_ref: (Cout, P) = relu(W @ X + b): one big-K MXU matmul + f32 epilogue.
    acc = jnp.dot(w_ref[...], x_ref[...], preferred_element_type=jnp.float32)
    o_ref[...] = jnp.maximum(acc + b_ref[...], 0.0).astype(o_ref.dtype)


def _tail_kernel(xg_ref, w3_ref, b3_ref, w4_ref, b4_ref, w5_ref, b5_ref,
                 wfc_ref, bfc_ref, sel_ref, mean_ref, o_ref):
    """Fused conv_3 + ReLU + MaxPool2d(2) + conv_4 + ReLU + conv_5 + ReLU
    + spatial mean + Linear(64,2) + softmax.

    xg_ref  : (K3, 4*128)  4 pool-tap im2col slabs, each 128-lane aligned
    sel_ref : (128, 9*128) constant 0/1 tap-selection matrix (3x3 map, pad=1);
              rows for invalid/padded positions are all-zero, so garbage in
              padded lanes never propagates.
    mean_ref: (128, N)     constant per-image spatial-mean pooling matrix
    o_ref   : (n_cls, N)   class probabilities (transposed to (N, n_cls) in glue)
    """
    pad = sel_ref.shape[0]
    n_pool = xg_ref.shape[1] // pad
    n_tap = sel_ref.shape[1] // pad

    # conv_3: ONE matmul across all pool taps, then max over the four aligned
    # 128-lane blocks.  maxpool(relu(conv + b)) == relu(max_g(conv_g) + b)
    # because the bias is tap-invariant and ReLU is monotone.
    y = jnp.dot(w3_ref[...], xg_ref[...], preferred_element_type=jnp.float32)
    m = y[:, 0:pad]
    for g in range(1, n_pool):                        # static unroll (4 taps)
        m = jnp.maximum(m, y[:, g * pad:(g + 1) * pad])
    h = jnp.maximum(m + b3_ref[...], 0.0)             # (32, 128)

    # conv_4 / conv_5 on the tiny 3x3 map: build the 9-tap im2col slab from the
    # VMEM-resident activation with one constant selection matmul, 128-aligned
    # lane slices and a sublane concat, then one big-K matmul.
    def conv3x3(h_in, w_ref, b_ref):
        t = jnp.dot(h_in, sel_ref[...], preferred_element_type=jnp.float32)
        xk = jnp.concatenate(
            [t[:, i * pad:(i + 1) * pad] for i in range(n_tap)], axis=0)
        acc = jnp.dot(w_ref[...], xk, preferred_element_type=jnp.float32)
        return jnp.maximum(acc + b_ref[...], 0.0)

    h = conv3x3(h, w4_ref, b4_ref)                    # (32, 128)
    h = conv3x3(h, w5_ref, b5_ref)                    # (64, 128)

    # Per-image spatial mean (constant pooling matrix), Linear(64, 2), softmax.
    mean = jnp.dot(h, mean_ref[...], preferred_element_type=jnp.float32)   # (64, N)
    logits = jnp.dot(wfc_ref[...], mean,
                     preferred_element_type=jnp.float32) + bfc_ref[...]    # (cls, N)
    z = logits - jnp.max(logits, axis=0, keepdims=True)
    e = jnp.exp(z)
    o_ref[...] = (e / jnp.sum(e, axis=0, keepdims=True)).astype(o_ref.dtype)


# ------------------------------ XLA glue ----------------------------------- #

def _im2col_cm(x_cm, kh, kw, stride, padding):
    """Channel-major (C, N, H, W) -> im2col slab (kh*kw*C, N*Ho*Wo); rows are
    tap-major (matching w.reshape(kh*kw*Cin, Cout)), columns p = (n*Ho+y)*Wo+x.
    One pad + 9 pure slices + one stack + one row-major reshape (no transposes)."""
    C, N, H, W = x_cm.shape
    if padding:
        x_cm = jnp.pad(x_cm, ((0, 0), (0, 0),
                              (padding, padding), (padding, padding)))
        H, W = H + 2 * padding, W + 2 * padding
    Ho = (H - kh) // stride + 1
    Wo = (W - kw) // stride + 1
    taps = [x_cm[:, :, dy:dy + stride * (Ho - 1) + 1:stride,
                       dx:dx + stride * (Wo - 1) + 1:stride]
            for dy in range(kh) for dx in range(kw)]
    slab = jnp.stack(taps, axis=0).reshape(kh * kw * C, N * Ho * Wo)
    return slab, Ho, Wo


def _pad_lanes(a, multiple=_PAD):
    p = (-a.shape[-1]) % multiple
    return jnp.pad(a, ((0, 0), (0, p))) if p else a


def conv2d_relu(x_cm, wb, *, stride=1, padding=0):
    """relu(conv2d 3x3) as one full-block Pallas matmul.  Channel-major in/out."""
    w, b = wb
    kh, kw, _, Cout = w.shape
    N = x_cm.shape[1]
    slab, Ho, Wo = _im2col_cm(x_cm.astype(jnp.float32), kh, kw, stride, padding)
    P = slab.shape[1]
    slab = _pad_lanes(slab)                       # lane-dense (unmasked) stores
    K, Pp = slab.shape
    wT = w.reshape(K, Cout).T.astype(jnp.float32)
    b2 = b.reshape(Cout, 1).astype(jnp.float32)

    yT = pl.pallas_call(
        _conv_relu_kernel,
        out_shape=jax.ShapeDtypeStruct((Cout, Pp), jnp.float32),
        grid=(1,),
        in_specs=[_spec((K, Pp)), _spec((Cout, K)), _spec((Cout, 1))],
        out_specs=_spec((Cout, Pp)),
        compiler_params=_cparams(),
    )(slab, wT, b2)
    return yT[:, :P].reshape(Cout, N, Ho, Wo)


def conv_pool_head(h_cm, wb3, wb4, wb5, wb_fc):
    """Fused conv_3 / pool / conv_4 / conv_5 / mean / FC / softmax launch.
    h_cm: channel-major (C, N, H, W) activation (output of conv_down_1)."""
    w3, b3 = wb3
    w4, b4 = wb4
    w5, b5 = wb5
    w_fc, b_fc = wb_fc
    C, N, H, W = h_cm.shape
    S = H // 2                                   # pooled spatial (floor mode)
    Pv = N * S * S
    assert Pv <= _PAD, "fused tail assumes N*S*S <= 128 pooled positions"
    kh = kw = 3
    K3 = kh * kw * C

    # 4 pool-tap im2col slabs evaluated only at the pooled output positions,
    # each padded to 128 lanes and concatenated side-by-side on the lane axis.
    hp = jnp.pad(h_cm.astype(jnp.float32), ((0, 0), (0, 0), (1, 1), (1, 1)))
    blocks = []
    for py in range(2):
        for px in range(2):
            taps = [hp[:, :, py + ky: py + ky + 2 * (S - 1) + 1: 2,
                          px + kx: px + kx + 2 * (S - 1) + 1: 2]
                    for ky in range(kh) for kx in range(kw)]
            blk = jnp.stack(taps, axis=0).reshape(K3, Pv)
            blocks.append(_pad_lanes(blk))
    xg = jnp.concatenate(blocks, axis=1)          # (K3, 4*128)

    # Compile-time constants (hoisted out of the kernel, per review):
    #   sel : 3x3/pad-1 tap-selection matrix used for conv_4 and conv_5 taps
    #   mean: per-image spatial-mean pooling matrix
    sel = np.zeros((_PAD, 9 * _PAD), np.float32)
    for t in range(9):
        dy, dx = t // 3 - 1, t % 3 - 1
        for n in range(N):
            for yy in range(S):
                for xx in range(S):
                    ys, xs = yy + dy, xx + dx
                    if 0 <= ys < S and 0 <= xs < S:
                        sel[n * S * S + ys * S + xs,
                            t * _PAD + n * S * S + yy * S + xx] = 1.0
    meanm = np.zeros((_PAD, N), np.float32)
    for n in range(N):
        meanm[n * S * S:(n + 1) * S * S, n] = 1.0 / (S * S)

    C3, C4, C5 = w3.shape[3], w4.shape[3], w5.shape[3]
    w3T = w3.reshape(K3, C3).T.astype(jnp.float32)           # (32, 144)
    b3v = b3.reshape(C3, 1).astype(jnp.float32)
    w4T = w4.reshape(9 * C3, C4).T.astype(jnp.float32)       # (32, 288)
    b4v = b4.reshape(C4, 1).astype(jnp.float32)
    w5T = w5.reshape(9 * C4, C5).T.astype(jnp.float32)       # (64, 288)
    b5v = b5.reshape(C5, 1).astype(jnp.float32)
    wfcT = w_fc.T.astype(jnp.float32)                        # (2, 64)
    bfcv = b_fc.reshape(-1, 1).astype(jnp.float32)           # (2, 1)
    n_cls = wfcT.shape[0]

    args = (xg, w3T, b3v, w4T, b4v, w5T, b5v, wfcT, bfcv,
            jnp.asarray(sel), jnp.asarray(meanm))
    probsT = pl.pallas_call(
        _tail_kernel,
        out_shape=jax.ShapeDtypeStruct((n_cls, N), jnp.float32),
        grid=(1,),
        in_specs=[_spec(a.shape) for a in args],
        out_specs=_spec((n_cls, N)),
        compiler_params=_cparams(),
    )(*args)
    return probsT.T                               # (N, n_cls)


def ident_net(x_nchw, params):
    # NCHW -> channel-major (C, N, H, W) once; everything after stays
    # channel-major so no per-layer transposes are needed.
    x = jnp.transpose(x_nchw.astype(jnp.float32), (1, 0, 2, 3))
    x = conv2d_relu(x, params["conv_1"], stride=1, padding=1)
    x = conv2d_relu(x, params["conv_2"], stride=1, padding=1)
    x = conv2d_relu(x, params["conv_down_1"], stride=2, padding=0)
    return conv_pool_head(x, params["conv_3"], params["conv_4"],
                          params["conv_5"], params["output"])


# --------------------------- params & reference ---------------------------- #

def init_params(key):
    def layer(k, kh, kw, cin, cout):
        k1, k2 = jax.random.split(k)
        bound = 1.0 / (kh * kw * cin) ** 0.5
        w = jax.random.uniform(k1, (kh, kw, cin, cout), jnp.float32, -bound, bound)
        b = jax.random.uniform(k2, (cout,), jnp.float32, -bound, bound)
        return w, b

    keys = jax.random.split(key, 8)
    params = {
        "conv_1": layer(keys[0], 3, 3, 3, 8),
        "conv_2": layer(keys[1], 3, 3, 8, 16),
        "conv_down_1": layer(keys[2], 3, 3, 16, 16),
        "conv_3": layer(keys[3], 3, 3, 16, 32),
        "conv_4": layer(keys[4], 3, 3, 32, 32),
        "conv_5": layer(keys[5], 3, 3, 32, 64),
    }
    bound = 1.0 / 64.0 ** 0.5
    w_fc = jax.random.uniform(keys[6], (64, 2), jnp.float32, -bound, bound)
    b_fc = jax.random.uniform(keys[7], (2,), jnp.float32, -bound, bound)
    params["output"] = (w_fc, b_fc)
    return params


def reference(x_nchw, params):
    """Pure-JAX f32 reference of the PyTorch forward."""
    def conv(x, wb, stride, padding):
        w, b = wb
        y = jax.lax.conv_general_dilated(
            x, w, window_strides=(stride, stride),
            padding=[(padding, padding), (padding, padding)],
            dimension_numbers=("NHWC", "HWIO", "NHWC"),
            precision=jax.lax.Precision.HIGHEST)
        return jax.nn.relu(y + b)

    x = jnp.transpose(x_nchw, (0, 2, 3, 1))
    x = conv(x, params["conv_1"], 1, 1)
    x = conv(x, params["conv_2"], 1, 1)
    x = conv(x, params["conv_down_1"], 2, 0)
    x = conv(x, params["conv_3"], 1, 1)
    n, h, w_, c = x.shape
    x = x[:, : (h // 2) * 2, : (w_ // 2) * 2, :]
    x = x.reshape(n, h // 2, 2, w_ // 2, 2, c).max(axis=(2, 4))   # MaxPool2d(2)
    x = conv(x, params["conv_4"], 1, 1)
    x = conv(x, params["conv_5"], 1, 1)
    x = x.mean(axis=(1, 2))
    w_fc, b_fc = params["output"]
    logits = x @ w_fc + b_fc
    return jax.nn.softmax(logits, axis=-1)


# ---------------------------------- main ----------------------------------- #

if __name__ == "__main__":
    kx, kp = jax.random.split(jax.random.PRNGKey(0))
    x = jax.random.normal(kx, (2, 3, 16, 16), jnp.float32)   # NCHW: Conv2d(3, ...)
    params = init_params(kp)

    out = jax.block_until_ready(jax.jit(ident_net)(x, params))
    assert out.shape == (2, 2), out.shape

    ref = reference(x, params)
    assert jnp.allclose(out, ref, rtol=1e-2, atol=5e-3), (out, ref)
    assert jnp.allclose(jnp.sum(out, axis=-1), 1.0, atol=1e-5)

    print("KERNEL_OK")
</pallas_src>

<mosaic_0001>
module attributes {stable_mosaic.version = 11 : i64} {
  func.func @_conv_relu_kernel(%arg0: i32, %arg1: memref<27x512xf32, #tpu.memory_space<vmem>>, %arg2: memref<8x27xf32, #tpu.memory_space<vmem>>, %arg3: memref<8x1xf32, #tpu.memory_space<vmem>>, %arg4: memref<8x512xf32, #tpu.memory_space<vmem>>) attributes {dimension_semantics = [#tpu.dimension_semantics<arbitrary>], iteration_bounds = array<i64: 1>, scalar_prefetch = 0 : i64, scratch_operands = 0 : i64, tpu.core_type = #tpu.core_type<tc>, window_params = [{pipeline_mode = #tpu.pipeline_mode<synchronous>, transform_indices = @transform_0, window_bounds = array<i64: 27, 512>}, {pipeline_mode = #tpu.pipeline_mode<synchronous>, transform_indices = @transform_1, window_bounds = array<i64: 8, 27>}, {pipeline_mode = #tpu.pipeline_mode<synchronous>, transform_indices = @transform_2, window_bounds = array<i64: 8, 1>}, {pipeline_mode = #tpu.pipeline_mode<synchronous>, transform_indices = @transform_3, window_bounds = array<i64: 8, 512>}]} {
    %c0 = arith.constant 0 : index
    %c0_0 = arith.constant 0 : index
    %0 = vector.load %arg2[%c0, %c0_0] : memref<8x27xf32, #tpu.memory_space<vmem>>, vector<8x27xf32>
    %c0_1 = arith.constant 0 : index
    %c0_2 = arith.constant 0 : index
    %1 = vector.load %arg1[%c0_1, %c0_2] : memref<27x512xf32, #tpu.memory_space<vmem>>, vector<27x512xf32>
    %cst = arith.constant dense<0.000000e+00> : vector<8x512xf32>
    %2 = tpu.matmul %0, %1, %cst {dimension_numbers = #tpu.dot_dimension_numbers<[1], [0], [0], [1], [0, 0, 1, 1], [], []>} : vector<8x27xf32>, vector<27x512xf32>, vector<8x512xf32> -> vector<8x512xf32>
    %c0_3 = arith.constant 0 : index
    %c0_4 = arith.constant 0 : index
    %3 = vector.load %arg3[%c0_3, %c0_4] : memref<8x1xf32, #tpu.memory_space<vmem>>, vector<8x1xf32>
    %4 = vector.broadcast %3 : vector<8x1xf32> to vector<8x512xf32>
    %5 = arith.addf %2, %4 : vector<8x512xf32>
    %cst_5 = arith.constant 0.000000e+00 : f32
    %6 = vector.broadcast %cst_5 : f32 to vector<8x512xf32>
    %7 = arith.maximumf %5, %6 : vector<8x512xf32>
    %c0_6 = arith.constant 0 : index
    %c0_7 = arith.constant 0 : index
    %8 = vector.load %arg4[%c0_6, %c0_7] : memref<8x512xf32, #tpu.memory_space<vmem>>, vector<8x512xf32>
    tpu.vector_store %arg4[%c0_6, %c0_7], %7 {strides = array<i32>} : memref<8x512xf32, #tpu.memory_space<vmem>>, vector<8x512xf32>,
    return
  }
  func.func @transform_0(%arg0: i32) -> (i32, i32) {
    %c0_i32 = arith.constant 0 : i32
    %c0_i32_0 = arith.constant 0 : i32
    %c0_i32_1 = arith.constant 0 : i32
    return %c0_i32, %c0_i32_0 : i32, i32
  }
  func.func @transform_1(%arg0: i32) -> (i32, i32) {
    %c0_i32 = arith.constant 0 : i32
    %c0_i32_0 = arith.constant 0 : i32
    %c0_i32_1 = arith.constant 0 : i32
    return %c0_i32, %c0_i32_0 : i32, i32
  }
  func.func @transform_2(%arg0: i32) -> (i32, i32) {
    %c0_i32 = arith.constant 0 : i32
    %c0_i32_0 = arith.constant 0 : i32
    %c0_i32_1 = arith.constant 0 : i32
    return %c0_i32, %c0_i32_0 : i32, i32
  }
  func.func @transform_3(%arg0: i32) -> (i32, i32) {
    %c0_i32 = arith.constant 0 : i32
    %c0_i32_0 = arith.constant 0 : i32
    %c0_i32_1 = arith.constant 0 : i32
    return %c0_i32, %c0_i32_0 : i32, i32
  }
}

module attributes {stable_mosaic.version = 11 : i64} {
  func.func @_conv_relu_kernel(%arg0: i32, %arg1: memref<72x512xf32, #tpu.memory_space<vmem>>, %arg2: memref<16x72xf32, #tpu.memory_space<vmem>>, %arg3: memref<16x1xf32, #tpu.memory_space<vmem>>, %arg4: memref<16x512xf32, #tpu.memory_space<vmem>>) attributes {dimension_semantics = [#tpu.dimension_semantics<arbitrary>], iteration_bounds = array<i64: 1>, scalar_prefetch = 0 : i64, scratch_operands = 0 : i64, tpu.core_type = #tpu.core_type<tc>, window_params = [{pipeline_mode = #tpu.pipeline_mode<synchronous>, transform_indices = @transform_0, window_bounds = array<i64: 72, 512>}, {pipeline_mode = #tpu.pipeline_mode<synchronous>, transform_indices = @transform_1, window_bounds = array<i64: 16, 72>}, {pipeline_mode = #tpu.pipeline_mode<synchronous>, transform_indices = @transform_2, window_bounds = array<i64: 16, 1>}, {pipeline_mode = #tpu.pipeline_mode<synchronous>, transform_indices = @transform_3, window_bounds = array<i64: 16, 512>}]} {
    %c0 = arith.constant 0 : index
    %c0_0 = arith.constant 0 : index
    %0 = vector.load %arg2[%c0, %c0_0] : memref<16x72xf32, #tpu.memory_space<vmem>>, vector<16x72xf32>
    %c0_1 = arith.constant 0 : index
    %c0_2 = arith.constant 0 : index
    %1 = vector.load %arg1[%c0_1, %c0_2] : memref<72x512xf32, #tpu.memory_space<vmem>>, vector<72x512xf32>
    %cst = arith.constant dense<0.000000e+00> : vector<16x512xf32>
    %2 = tpu.matmul %0, %1, %cst {dimension_numbers = #tpu.dot_dimension_numbers<[1], [0], [0], [1], [0, 0, 1, 1], [], []>} : vector<16x72xf32>, vector<72x512xf32>, vector<16x512xf32> -> vector<16x512xf32>
    %c0_3 = arith.constant 0 : index
    %c0_4 = arith.constant 0 : index
    %3 = vector.load %arg3[%c0_3, %c0_4] : memref<16x1xf32, #tpu.memory_space<vmem>>, vector<16x1xf32>
    %4 = vector.broadcast %3 : vector<16x1xf32> to vector<16x512xf32>
    %5 = arith.addf %2, %4 : vector<16x512xf32>
    %cst_5 = arith.constant 0.000000e+00 : f32
    %6 = vector.broadcast %cst_5 : f32 to vector<16x512xf32>
    %7 = arith.maximumf %5, %6 : vector<16x512xf32>
    %c0_6 = arith.constant 0 : index
    %c0_7 = arith.constant 0 : index
    %8 = vector.load %arg4[%c0_6, %c0_7] : memref<16x512xf32, #tpu.memory_space<vmem>>, vector<16x512xf32>
    tpu.vector_store %arg4[%c0_6, %c0_7], %7 {strides = array<i32>} : memref<16x512xf32, #tpu.memory_space<vmem>>, vector<16x512xf32>,
    return
  }
  func.func @transform_0(%arg0: i32) -> (i32, i32) {
    %c0_i32 = arith.constant 0 : i32
    %c0_i32_0 = arith.constant 0 : i32
    %c0_i32_1 = arith.constant 0 : i32
    return %c0_i32, %c0_i32_0 : i32, i32
  }
  func.func @transform_1(%arg0: i32) -> (i32, i32) {
    %c0_i32 = arith.constant 0 : i32
    %c0_i32_0 = arith.constant 0 : i32
    %c0_i32_1 = arith.constant 0 : i32
    return %c0_i32, %c0_i32_0 : i32, i32
  }
  func.func @transform_2(%arg0: i32) -> (i32, i32) {
    %c0_i32 = arith.constant 0 : i32
    %c0_i32_0 = arith.constant 0 : i32
    %c0_i32_1 = arith.constant 0 : i32
    return %c0_i32, %c0_i32_0 : i32, i32
  }
  func.func @transform_3(%arg0: i32) -> (i32, i32) {
    %c0_i32 = arith.constant 0 : i32
    %c0_i32_0 = arith.constant 0 : i32
    %c0_i32_1 = arith.constant 0 : i32
    return %c0_i32, %c0_i32_0 : i32, i32
  }
}

module attributes {stable_mosaic.version = 11 : i64} {
  func.func @_conv_relu_kernel(%arg0: i32, %arg1: memref<144x128xf32, #tpu.memory_space<vmem>>, %arg2: memref<16x144xf32, #tpu.memory_space<vmem>>, %arg3: memref<16x1xf32, #tpu.memory_space<vmem>>, %arg4: memref<16x128xf32, #tpu.memory_space<vmem>>) attributes {dimension_semantics = [#tpu.dimension_semantics<arbitrary>], iteration_bounds = array<i64: 1>, scalar_prefetch = 0 : i64, scratch_operands = 0 : i64, tpu.core_type = #tpu.core_type<tc>, window_params = [{pipeline_mode = #tpu.pipeline_mode<synchronous>, transform_indices = @transform_0, window_bounds = array<i64: 144, 128>}, {pipeline_mode = #tpu.pipeline_mode<synchronous>, transform_indices = @transform_1, window_bounds = array<i64: 16, 144>}, {pipeline_mode = #tpu.pipeline_mode<synchronous>, transform_indices = @transform_2, window_bounds = array<i64: 16, 1>}, {pipeline_mode = #tpu.pipeline_mode<synchronous>, transform_indices = @transform_3, window_bounds = array<i64: 16, 128>}]} {
    %c0 = arith.constant 0 : index
    %c0_0 = arith.constant 0 : index
    %0 = vector.load %arg2[%c0, %c0_0] : memref<16x144xf32, #tpu.memory_space<vmem>>, vector<16x144xf32>
    %c0_1 = arith.constant 0 : index
    %c0_2 = arith.constant 0 : index
    %1 = vector.load %arg1[%c0_1, %c0_2] : memref<144x128xf32, #tpu.memory_space<vmem>>, vector<144x128xf32>
    %cst = arith.constant dense<0.000000e+00> : vector<16x128xf32>
    %2 = tpu.matmul %0, %1, %cst {dimension_numbers = #tpu.dot_dimension_numbers<[1], [0], [0], [1], [0, 0, 1, 1], [], []>} : vector<16x144xf32>, vector<144x128xf32>, vector<16x128xf32> -> vector<16x128xf32>
    %c0_3 = arith.constant 0 : index
    %c0_4 = arith.constant 0 : index
    %3 = vector.load %arg3[%c0_3, %c0_4] : memref<16x1xf32, #tpu.memory_space<vmem>>, vector<16x1xf32>
    %4 = vector.broadcast %3 : vector<16x1xf32> to vector<16x128xf32>
    %5 = arith.addf %2, %4 : vector<16x128xf32>
    %cst_5 = arith.constant 0.000000e+00 : f32
    %6 = vector.broadcast %cst_5 : f32 to vector<16x128xf32>
    %7 = arith.maximumf %5, %6 : vector<16x128xf32>
    %c0_6 = arith.constant 0 : index
    %c0_7 = arith.constant 0 : index
    %8 = vector.load %arg4[%c0_6, %c0_7] : memref<16x128xf32, #tpu.memory_space<vmem>>, vector<16x128xf32>
    tpu.vector_store %arg4[%c0_6, %c0_7], %7 {strides = array<i32>} : memref<16x128xf32, #tpu.memory_space<vmem>>, vector<16x128xf32>,
    return
  }
  func.func @transform_0(%arg0: i32) -> (i32, i32) {
    %c0_i32 = arith.constant 0 : i32
    %c0_i32_0 = arith.constant 0 : i32
    %c0_i32_1 = arith.constant 0 : i32
    return %c0_i32, %c0_i32_0 : i32, i32
  }
  func.func @transform_1(%arg0: i32) -> (i32, i32) {
    %c0_i32 = arith.constant 0 : i32
    %c0_i32_0 = arith.constant 0 : i32
    %c0_i32_1 = arith.constant 0 : i32
    return %c0_i32, %c0_i32_0 : i32, i32
  }
  func.func @transform_2(%arg0: i32) -> (i32, i32) {
    %c0_i32 = arith.constant 0 : i32
    %c0_i32_0 = arith.constant 0 : i32
    %c0_i32_1 = arith.constant 0 : i32
    return %c0_i32, %c0_i32_0 : i32, i32
  }
  func.func @transform_3(%arg0: i32) -> (i32, i32) {
    %c0_i32 = arith.constant 0 : i32
    %c0_i32_0 = arith.constant 0 : i32
    %c0_i32_1 = arith.constant 0 : i32
    return %c0_i32, %c0_i32_0 : i32, i32
  }
}

module attributes {stable_mosaic.version = 11 : i64} {
  func.func @_tail_kernel(%arg0: i32, %arg1: memref<144x512xf32, #tpu.memory_space<vmem>>, %arg2: memref<32x144xf32, #tpu.memory_space<vmem>>, %arg3: memref<32x1xf32, #tpu.memory_space<vmem>>, %arg4: memref<32x288xf32, #tpu.memory_space<vmem>>, %arg5: memref<32x1xf32, #tpu.memory_space<vmem>>, %arg6: memref<64x288xf32, #tpu.memory_space<vmem>>, %arg7: memref<64x1xf32, #tpu.memory_space<vmem>>, %arg8: memref<2x64xf32, #tpu.memory_space<vmem>>, %arg9: memref<2x1xf32, #tpu.memory_space<vmem>>, %arg10: memref<128x1152xf32, #tpu.memory_space<vmem>>, %arg11: memref<128x2xf32, #tpu.memory_space<vmem>>, %arg12: memref<2x2xf32, #tpu.memory_space<vmem>>) attributes {dimension_semantics = [#tpu.dimension_semantics<arbitrary>], iteration_bounds = array<i64: 1>, scalar_prefetch = 0 : i64, scratch_operands = 0 : i64, tpu.core_type = #tpu.core_type<tc>, window_params = [{pipeline_mode = #tpu.pipeline_mode<synchronous>, transform_indices = @transform_0, window_bounds = array<i64: 144, 512>}, {pipeline_mode = #tpu.pipeline_mode<synchronous>, transform_indices = @transform_1, window_bounds = array<i64: 32, 144>}, {pipeline_mode = #tpu.pipeline_mode<synchronous>, transform_indices = @transform_2, window_bounds = array<i64: 32, 1>}, {pipeline_mode = #tpu.pipeline_mode<synchronous>, transform_indices = @transform_3, window_bounds = array<i64: 32, 288>}, {pipeline_mode = #tpu.pipeline_mode<synchronous>, transform_indices = @transform_4, window_bounds = array<i64: 32, 1>}, {pipeline_mode = #tpu.pipeline_mode<synchronous>, transform_indices = @transform_5, window_bounds = array<i64: 64, 288>}, {pipeline_mode = #tpu.pipeline_mode<synchronous>, transform_indices = @transform_6, window_bounds = array<i64: 64, 1>}, {pipeline_mode = #tpu.pipeline_mode<synchronous>, transform_indices = @transform_7, window_bounds = array<i64: 2, 64>}, {pipeline_mode = #tpu.pipeline_mode<synchronous>, transform_indices = @transform_8, window_bounds = array<i64: 2, 1>}, {pipeline_mode = #tpu.pipeline_mode<synchronous>, transform_indices = @transform_9, window_bounds = array<i64: 128, 1152>}, {pipeline_mode = #tpu.pipeline_mode<synchronous>, transform_indices = @transform_10, window_bounds = array<i64: 128, 2>}, {pipeline_mode = #tpu.pipeline_mode<synchronous>, transform_indices = @transform_11, window_bounds = array<i64: 2, 2>}]} {
    %c0 = arith.constant 0 : index
    %c0_0 = arith.constant 0 : index
    %0 = vector.load %arg2[%c0, %c0_0] : memref<32x144xf32, #tpu.memory_space<vmem>>, vector<32x144xf32>
    %c0_1 = arith.constant 0 : index
    %c0_2 = arith.constant 0 : index
    %1 = vector.load %arg1[%c0_1, %c0_2] : memref<144x512xf32, #tpu.memory_space<vmem>>, vector<144x512xf32>
    %cst = arith.constant dense<0.000000e+00> : vector<32x512xf32>
    %2 = tpu.matmul %0, %1, %cst {dimension_numbers = #tpu.dot_dimension_numbers<[1], [0], [0], [1], [0, 0, 1, 1], [], []>} : vector<32x144xf32>, vector<144x512xf32>, vector<32x512xf32> -> vector<32x512xf32>
    %3 = vector.extract_strided_slice %2 {offsets = [0, 0], sizes = [32, 128], strides = [1, 1]} : vector<32x512xf32> to vector<32x128xf32>
    %4 = vector.extract_strided_slice %2 {offsets = [0, 128], sizes = [32, 128], strides = [1, 1]} : vector<32x512xf32> to vector<32x128xf32>
    %5 = arith.maximumf %3, %4 : vector<32x128xf32>
    %6 = vector.extract_strided_slice %2 {offsets = [0, 256], sizes = [32, 128], strides = [1, 1]} : vector<32x512xf32> to vector<32x128xf32>
    %7 = arith.maximumf %5, %6 : vector<32x128xf32>
    %8 = vector.extract_strided_slice %2 {offsets = [0, 384], sizes = [32, 128], strides = [1, 1]} : vector<32x512xf32> to vector<32x128xf32>
    %9 = arith.maximumf %7, %8 : vector<32x128xf32>
    %c0_3 = arith.constant 0 : index
    %c0_4 = arith.constant 0 : index
    %10 = vector.load %arg3[%c0_3, %c0_4] : memref<32x1xf32, #tpu.memory_space<vmem>>, vector<32x1xf32>
    %11 = vector.broadcast %10 : vector<32x1xf32> to vector<32x128xf32>
    %12 = arith.addf %9, %11 : vector<32x128xf32>
    %cst_5 = arith.constant 0.000000e+00 : f32
    %13 = vector.broadcast %cst_5 : f32 to vector<32x128xf32>
    %14 = arith.maximumf %12, %13 : vector<32x128xf32>
    %c0_6 = arith.constant 0 : index
    %c0_7 = arith.constant 0 : index
    %15 = vector.load %arg10[%c0_6, %c0_7] : memref<128x1152xf32, #tpu.memory_space<vmem>>, vector<128x1152xf32>
    %cst_8 = arith.constant dense<0.000000e+00> : vector<32x1152xf32>
    %16 = tpu.matmul %14, %15, %cst_8 {dimension_numbers = #tpu.dot_dimension_numbers<[1], [0], [0], [1], [0, 0, 1, 1], [], []>} : vector<32x128xf32>, vector<128x1152xf32>, vector<32x1152xf32> -> vector<32x1152xf32>
    %17 = vector.extract_strided_slice %16 {offsets = [0, 0], sizes = [32, 128], strides = [1, 1]} : vector<32x1152xf32> to vector<32x128xf32>
    %18 = vector.extract_strided_slice %16 {offsets = [0, 128], sizes = [32, 128], strides = [1, 1]} : vector<32x1152xf32> to vector<32x128xf32>
    %19 = vector.extract_strided_slice %16 {offsets = [0, 256], sizes = [32, 128], strides = [1, 1]} : vector<32x1152xf32> to vector<32x128xf32>
    %20 = vector.extract_strided_slice %16 {offsets = [0, 384], sizes = [32, 128], strides = [1, 1]} : vector<32x1152xf32> to vector<32x128xf32>
    %21 = vector.extract_strided_slice %16 {offsets = [0, 512], sizes = [32, 128], strides = [1, 1]} : vector<32x1152xf32> to vector<32x128xf32>
    %22 = vector.extract_strided_slice %16 {offsets = [0, 640], sizes = [32, 128], strides = [1, 1]} : vector<32x1152xf32> to vector<32x128xf32>
    %23 = vector.extract_strided_slice %16 {offsets = [0, 768], sizes = [32, 128], strides = [1, 1]} : vector<32x1152xf32> to vector<32x128xf32>
    %24 = vector.extract_strided_slice %16 {offsets = [0, 896], sizes = [32, 128], strides = [1, 1]} : vector<32x1152xf32> to vector<32x128xf32>
    %25 = vector.extract_strided_slice %16 {offsets = [0, 1024], sizes = [32, 128], strides = [1, 1]} : vector<32x1152xf32> to vector<32x128xf32>
    %26 = tpu.concatenate %17, %18, %19, %20, %21, %22, %23, %24, %25 in 0 : vector<32x128xf32>, vector<32x128xf32>, vector<32x128xf32>, vector<32x128xf32>, vector<32x128xf32>, vector<32x128xf32>, vector<32x128xf32>, vector<32x128xf32>, vector<32x128xf32> -> vector<288x128xf32>
    %c0_9 = arith.constant 0 : index
    %c0_10 = arith.constant 0 : index
    %27 = vector.load %arg4[%c0_9, %c0_10] : memref<32x288xf32, #tpu.memory_space<vmem>>, vector<32x288xf32>
    %cst_11 = arith.constant dense<0.000000e+00> : vector<32x128xf32>
    %28 = tpu.matmul %27, %26, %cst_11 {dimension_numbers = #tpu.dot_dimension_numbers<[1], [0], [0], [1], [0, 0, 1, 1], [], []>} : vector<32x288xf32>, vector<288x128xf32>, vector<32x128xf32> -> vector<32x128xf32>
    %c0_12 = arith.constant 0 : index
    %c0_13 = arith.constant 0 : index
    %29 = vector.load %arg5[%c0_12, %c0_13] : memref<32x1xf32, #tpu.memory_space<vmem>>, vector<32x1xf32>
    %30 = vector.broadcast %29 : vector<32x1xf32> to vector<32x128xf32>
    %31 = arith.addf %28, %30 : vector<32x128xf32>
    %cst_14 = arith.constant 0.000000e+00 : f32
    %32 = vector.broadcast %cst_14 : f32 to vector<32x128xf32>
    %33 = arith.maximumf %31, %32 : vector<32x128xf32>
    %c0_15 = arith.constant 0 : index
    %c0_16 = arith.constant 0 : index
    %34 = vector.load %arg10[%c0_15, %c0_16] : memref<128x1152xf32, #tpu.memory_space<vmem>>, vector<128x1152xf32>
    %cst_17 = arith.constant dense<0.000000e+00> : vector<32x1152xf32>
    %35 = tpu.matmul %33, %34, %cst_17 {dimension_numbers = #tpu.dot_dimension_numbers<[1], [0], [0], [1], [0, 0, 1, 1], [], []>} : vector<32x128xf32>, vector<128x1152xf32>, vector<32x1152xf32> -> vector<32x1152xf32>
    %36 = vector.extract_strided_slice %35 {offsets = [0, 0], sizes = [32, 128], strides = [1, 1]} : vector<32x1152xf32> to vector<32x128xf32>
    %37 = vector.extract_strided_slice %35 {offsets = [0, 128], sizes = [32, 128], strides = [1, 1]} : vector<32x1152xf32> to vector<32x128xf32>
    %38 = vector.extract_strided_slice %35 {offsets = [0, 256], sizes = [32, 128], strides = [1, 1]} : vector<32x1152xf32> to vector<32x128xf32>
    %39 = vector.extract_strided_slice %35 {offsets = [0, 384], sizes = [32, 128], strides = [1, 1]} : vector<32x1152xf32> to vector<32x128xf32>
    %40 = vector.extract_strided_slice %35 {offsets = [0, 512], sizes = [32, 128], strides = [1, 1]} : vector<32x1152xf32> to vector<32x128xf32>
    %41 = vector.extract_strided_slice %35 {offsets = [0, 640], sizes = [32, 128], strides = [1, 1]} : vector<32x1152xf32> to vector<32x128xf32>
    %42 = vector.extract_strided_slice %35 {offsets = [0, 768], sizes = [32, 128], strides = [1, 1]} : vector<32x1152xf32> to vector<32x128xf32>
    %43 = vector.extract_strided_slice %35 {offsets = [0, 896], sizes = [32, 128], strides = [1, 1]} : vector<32x1152xf32> to vector<32x128xf32>
    %44 = vector.extract_strided_slice %35 {offsets = [0, 1024], sizes = [32, 128], strides = [1, 1]} : vector<32x1152xf32> to vector<32x128xf32>
    %45 = tpu.concatenate %36, %37, %38, %39, %40, %41, %42, %43, %44 in 0 : vector<32x128xf32>, vector<32x128xf32>, vector<32x128xf32>, vector<32x128xf32>, vector<32x128xf32>, vector<32x128xf32>, vector<32x128xf32>, vector<32x128xf32>, vector<32x128xf32> -> vector<288x128xf32>
    %c0_18 = arith.constant 0 : index
    %c0_19 = arith.constant 0 : index
    %46 = vector.load %arg6[%c0_18, %c0_19] : memref<64x288xf32, #tpu.memory_space<vmem>>, vector<64x288xf32>
    %cst_20 = arith.constant dense<0.000000e+00> : vector<64x128xf32>
    %47 = tpu.matmul %46, %45, %cst_20 {dimension_numbers = #tpu.dot_dimension_numbers<[1], [0], [0], [1], [0, 0, 1, 1], [], []>} : vector<64x288xf32>, vector<288x128xf32>, vector<64x128xf32> -> vector<64x128xf32>
    %c0_21 = arith.constant 0 : index
    %c0_22 = arith.constant 0 : index
    %48 = vector.load %arg7[%c0_21, %c0_22] : memref<64x1xf32, #tpu.memory_space<vmem>>, vector<64x1xf32>
    %49 = vector.broadcast %48 : vector<64x1xf32> to vector<64x128xf32>
    %50 = arith.addf %47, %49 : vector<64x128xf32>
    %cst_23 = arith.constant 0.000000e+00 : f32
    %51 = vector.broadcast %cst_23 : f32 to vector<64x128xf32>
    %52 = arith.maximumf %50, %51 : vector<64x128xf32>
    %c0_24 = arith.constant 0 : index
    %c0_25 = arith.constant 0 : index
    %53 = vector.load %arg11[%c0_24, %c0_25] : memref<128x2xf32, #tpu.memory_space<vmem>>, vector<128x2xf32>
    %cst_26 = arith.constant dense<0.000000e+00> : vector<64x2xf32>
    %54 = tpu.matmul %52, %53, %cst_26 {dimension_numbers = #tpu.dot_dimension_numbers<[1], [0], [0], [1], [0, 0, 1, 1], [], []>} : vector<64x128xf32>, vector<128x2xf32>, vector<64x2xf32> -> vector<64x2xf32>
    %c0_27 = arith.constant 0 : index
    %c0_28 = arith.constant 0 : index
    %55 = vector.load %arg8[%c0_27, %c0_28] : memref<2x64xf32, #tpu.memory_space<vmem>>, vector<2x64xf32>
    %cst_29 = arith.constant dense<0.000000e+00> : vector<2x2xf32>
    %56 = tpu.matmul %55, %54, %cst_29 {dimension_numbers = #tpu.dot_dimension_numbers<[1], [0], [0], [1], [0, 0, 1, 1], [], []>} : vector<2x64xf32>, vector<64x2xf32>, vector<2x2xf32> -> vector<2x2xf32>
    %c0_30 = arith.constant 0 : index
    %c0_31 = arith.constant 0 : index
    %57 = vector.load %arg9[%c0_30, %c0_31] : memref<2x1xf32, #tpu.memory_space<vmem>>, vector<2x1xf32>
    %58 = vector.broadcast %57 : vector<2x1xf32> to vector<2x2xf32>
    %59 = arith.addf %56, %58 : vector<2x2xf32>
    %cst_32 = arith.constant dense<0xFF800000> : vector<2xf32>
    %60 = vector.multi_reduction <maximumf>, %59, %cst_32 [0] : vector<2x2xf32> to vector<2xf32>
    %61 = vector.shape_cast %60 : vector<2xf32> to vector<1x2xf32>
    %62 = vector.broadcast %61 : vector<1x2xf32> to vector<2x2xf32>
    %63 = arith.subf %59, %62 : vector<2x2xf32>
    %64 = math.exp %63 : vector<2x2xf32>
    %cst_33 = arith.constant dense<0.000000e+00> : vector<2xf32>
    %65 = vector.multi_reduction <add>, %64, %cst_33 [0] : vector<2x2xf32> to vector<2xf32>
    %66 = vector.shape_cast %65 : vector<2xf32> to vector<1x2xf32>
    %67 = vector.broadcast %66 : vector<1x2xf32> to vector<2x2xf32>
    %68 = arith.divf %64, %67 : vector<2x2xf32>
    %c0_34 = arith.constant 0 : index
    %c0_35 = arith.constant 0 : index
    %69 = vector.load %arg12[%c0_34, %c0_35] : memref<2x2xf32, #tpu.memory_space<vmem>>, vector<2x2xf32>
    tpu.vector_store %arg12[%c0_34, %c0_35], %68 {strides = array<i32>} : memref<2x2xf32, #tpu.memory_space<vmem>>, vector<2x2xf32>,
    return
  }
  func.func @transform_0(%arg0: i32) -> (i32, i32) {
    %c0_i32 = arith.constant 0 : i32
    %c0_i32_0 = arith.constant 0 : i32
    %c0_i32_1 = arith.constant 0 : i32
    return %c0_i32, %c0_i32_0 : i32, i32
  }
  func.func @transform_1(%arg0: i32) -> (i32, i32) {
    %c0_i32 = arith.constant 0 : i32
    %c0_i32_0 = arith.constant 0 : i32
    %c0_i32_1 = arith.constant 0 : i32
    return %c0_i32, %c0_i32_0 : i32, i32
  }
  func.func @transform_2(%arg0: i32) -> (i32, i32) {
    %c0_i32 = arith.constant 0 : i32
    %c0_i32_0 = arith.constant 0 : i32
    %c0_i32_1 = arith.constant 0 : i32
    return %c0_i32, %c0_i32_0 : i32, i32
  }
  func.func @transform_3(%arg0: i32) -> (i32, i32) {
    %c0_i32 = arith.constant 0 : i32
    %c0_i32_0 = arith.constant 0 : i32
    %c0_i32_1 = arith.constant 0 : i32
    return %c0_i32, %c0_i32_0 : i32, i32
  }
  func.func @transform_4(%arg0: i32) -> (i32, i32) {
    %c0_i32 = arith.constant 0 : i32
    %c0_i32_0 = arith.constant 0 : i32
    %c0_i32_1 = arith.constant 0 : i32
    return %c0_i32, %c0_i32_0 : i32, i32
  }
  func.func @transform_5(%arg0: i32) -> (i32, i32) {
    %c0_i32 = arith.constant 0 : i32
    %c0_i32_0 = arith.constant 0 : i32
    %c0_i32_1 = arith.constant 0 : i32
    return %c0_i32, %c0_i32_0 : i32, i32
  }
  func.func @transform_6(%arg0: i32) -> (i32, i32) {
    %c0_i32 = arith.constant 0 : i32
    %c0_i32_0 = arith.constant 0 : i32
    %c0_i32_1 = arith.constant 0 : i32
    return %c0_i32, %c0_i32_0 : i32, i32
  }
  func.func @transform_7(%arg0: i32) -> (i32, i32) {
    %c0_i32 = arith.constant 0 : i32
    %c0_i32_0 = arith.constant 0 : i32
    %c0_i32_1 = arith.constant 0 : i32
    return %c0_i32, %c0_i32_0 : i32, i32
  }
  func.func @transform_8(%arg0: i32) -> (i32, i32) {
    %c0_i32 = arith.constant 0 : i32
    %c0_i32_0 = arith.constant 0 : i32
    %c0_i32_1 = arith.constant 0 : i32
    return %c0_i32, %c0_i32_0 : i32, i32
  }
  func.func @transform_9(%arg0: i32) -> (i32, i32) {
    %c0_i32 = arith.constant 0 : i32
    %c0_i32_0 = arith.constant 0 : i32
    %c0_i32_1 = arith.constant 0 : i32
    return %c0_i32, %c0_i32_0 : i32, i32
  }
  func.func @transform_10(%arg0: i32) -> (i32, i32) {
    %c0_i32 = arith.constant 0 : i32
    %c0_i32_0 = arith.constant 0 : i32
    %c0_i32_1 = arith.constant 0 : i32
    return %c0_i32, %c0_i32_0 : i32, i32
  }
  func.func @transform_11(%arg0: i32) -> (i32, i32) {
    %c0_i32 = arith.constant 0 : i32
    %c0_i32_0 = arith.constant 0 : i32
    %c0_i32_1 = arith.constant 0 : i32
    return %c0_i32, %c0_i32_0 : i32, i32
  }
}

</mosaic_0001>

<bundles_post_ra>
// kernel: ident_net.4
= control target key start
LH: loop header
LB: loop body
LE: loop exit
PB: predicated region body
PF: predicated region fallthrough
CT: control target
= control target key end

     0   :  { %vm41_vm0 = vcmask 1042432   ;;  %v238_v3 = vmov 0.0   ;;  %v239_v8 = vmov 0   ;;  %vm240_vm1 = vmmov 1   ;;  %s340_s0 = inlined_call_operand.vmem [shape: f32[27,512], index: 0, kind: input, shape index: {}]   ;;  %s341_s2 = inlined_call_operand.vmem [shape: f32[8,1], index: 2, kind: input, shape index: {}]   ;;  %s342_s1 = inlined_call_operand.vmem [shape: f32[8,27], index: 1, kind: input, shape index: {}]   ;;  %s343_s3 = inlined_call_operand.vmem [shape: f32[8,512], index: 3, kind: output, shape index: {}]  }
   0x1   :  { %v16_v0 = vld [vmem:[%s340_s0 + $0x8] sm:$0xff]  ;;  %v18_v2 = vld [vmem:[%s340_s0 + $0x18] sm:$0xff]  ;;  %118 = vmatprep.mubr.f32.mxu0 %v238_v3  ;;  %189 = vmatprep.mubr.f32.mxu1 %v238_v3  ;;  %v15_v6 = vld [vmem:[%s340_s0] sm:$0xff]  ;;  %vm37_vm3 = vcmask 220160  }
   0x2   :  { %v20_v1 = vld [vmem:[%s340_s0 + $0x28] sm:$0xff]  ;;  %v22_v5 = vld [vmem:[%s340_s0 + $0x38] sm:$0xff]  ;;  %v19_v7 = vld [vmem:[%s340_s0 + $0x20] sm:$0xff]  ;;  %237 = vset.pattern.permute.xlu0 %v239_v8 }
   0x3   :  { %v214_v4 = vpack.c.bf16 %v20_v1, %v16_v0  ;;  %v224_v9 = vpack.c.bf16 %v22_v5, %v18_v2  ;;  %v216_v10 = vpack.c.bf16 %v19_v7, %v15_v6  ;;  %v17_v11 = vld [vmem:[%s340_s0 + $0x10] sm:$0xff]  ;;  %v24_v13 = vld [vmem:[%s340_s0 + $0x48] sm:$0xff]  ;;  %vm292_vm2 = vmpackc.low %vm41_vm0, %vm240_vm1 }
   0x4   :  { %v21_v12 = vld [vmem:[%s340_s0 + $0x30] sm:$0xff]  ;;  %v28_v15 = vld [vmem:[%s340_s0 + $0x68] sm:$0x7]  ;;  %v26_v17 = vld [vmem:[%s340_s0 + $0x58] sm:$0xff] }
   0x5   :  { %215 = vmatprep.subr.bf16.mxu0 %v214_v4  ;;  %v226_v14 = vpack.c.bf16 %v21_v12, %v17_v11  ;;  %225 = vmatprep.subr.bf16.mxu1 %v224_v9  ;;  %v218_v18 = vpack.c.bf16 %v28_v15, %v24_v13  ;;  %v30_v19 = vld [vmem:[%s340_s0 + $0x78] sm:$0x7]  ;;  %v23_v20 = vld [vmem:[%s340_s0 + $0x40] sm:$0xff]  ;;  %v25_v24 = vld [vmem:[%s340_s0 + $0x50] sm:$0xff] }
   0x6   :  { %217 = vmatpush1.bf16.msra.mxu0 %v216_v10  ;;  %v27_v21 = vld [vmem:[%s340_s0 + $0x60] sm:$0x7]  ;;  %v228_v22 = vpack.c.bf16 %v30_v19, %v26_v17  ;;  %v29_v25 = vld [vmem:[%s340_s0 + $0x70] sm:$0x7] }
   0x7   :  { %227 = vmatpush1.bf16.msra.mxu1 %v226_v14  ;;  %v221_v23 = vpack.c.bf16 %v27_v21, %v23_v20  ;;  %220 = vmatprep.subr.msk.bf16.mxu0 %vm292_vm2, %v218_v18  ;;  %v231_v26 = vpack.c.bf16 %v29_v25, %v25_v24  ;;  %v31_v27 = vld [vmem:[%s341_s2] sm:$0xff] }
   0x8   :  { %230 = vmatprep.subr.msk.bf16.mxu1 %vm292_vm2, %v228_v22  ;;  %34 = vperm.xlu0 %237, %v31_v27   ;;  %v14_v28 = vld [vmem:[%s342_s1] sm:$0xff] }
   0xa   :  { %223 = vmatpush1.bf16.msk.msra.mxu0 %vm292_vm2, %v221_v23 }
   0xb   :  { %233 = vmatpush1.bf16.msk.msra.mxu1 %vm292_vm2, %v231_v26 }
   0xd   :  { %210 = vmatmul.mubr.msk.f32.vlgmr.msra.gmra.mrb[0].mxu0 %vm37_vm3, %v14_v28 }
   0xe   :  { %213 = vmatmul.mubr.msk.f32.vlgmr.msra.gmra.mrb[0].mxu1 %vm37_vm3, %v14_v28 }
  0x87   :  { %v35_v29 = vpop.permute.xlu0 %34 }
  0xe0   :  { %v120_v30 = vpop.f32.mrb[0].mxu0 }
  0xe1   :  { %v121_v31 = vadd.f32 %v120_v30, %v35_v29  ;;  %v191_v32 = vpop.f32.mrb[0].mxu1  ;;  %v122_v33 = vpop.f32.mrb[1].mxu0 }
  0xe2   :  { %v192_v34 = vadd.f32 %v191_v32, %v35_v29  ;;  %v123_v35 = vadd.f32 %v122_v33, %v35_v29  ;;  %v193_v36 = vpop.f32.mrb[1].mxu1 }
  0xe3   :  { %v196_v37 = vmax.f32 %v121_v31, 0.0  ;;  %v194_v38 = vadd.f32 %v193_v36, %v35_v29 }
  0xe4   :  { %v198_v39 = vmax.f32 %v192_v34, 0.0  ;;  %v197_v40 = vmax.f32 %v123_v35, 0.0 }
  0xe5   :  { %200 = vst [vmem:[%s343_s3] sm:$0xff] %v196_v37  ;;  %v199_v41 = vmax.f32 %v194_v38, 0.0 }
  0xe6   :  { %202 = vst [vmem:[%s343_s3 + $0x10] sm:$0xff] %v198_v39  ;;  %201 = vst [vmem:[%s343_s3 + $0x8] sm:$0xff] %v197_v40 }
  0xe7   :  { %203 = vst [vmem:[%s343_s3 + $0x18] sm:$0xff] %v199_v41 }

// kernel: ident_net.5
= control target key start
LH: loop header
LB: loop body
LE: loop exit
PB: predicated region body
PF: predicated region fallthrough
CT: control target
= control target key end

     0   :  { %v284_v3 = vmov 0.0   ;;  %v285_v8 = vmov 0   ;;  %vm64_vm0 = vcmask 588800   ;;  %s454_s0 = inlined_call_operand.vmem [shape: f32[72,512], index: 0, kind: input, shape index: {}]   ;;  %s455_s2 = inlined_call_operand.vmem [shape: f32[16,1], index: 2, kind: input, shape index: {}]   ;;  %s456_s1 = inlined_call_operand.vmem [shape: f32[16,72], index: 1, kind: input, shape index: {}]   ;;  %s457_s3 = inlined_call_operand.vmem [shape: f32[16,512], index: 3, kind: output, shape index: {}]  }
   0x1   :  { %v17_v0 = vld [vmem:[%s454_s0 + $0x8] sm:$0xff]  ;;  %v19_v2 = vld [vmem:[%s454_s0 + $0x18] sm:$0xff]  ;;  %135 = vmatprep.mubr.f32.mxu0 %v284_v3  ;;  %212 = vmatprep.mubr.f32.mxu1 %v284_v3  ;;  %v16_v6 = vld [vmem:[%s454_s0] sm:$0xff] }
   0x2   :  { %v21_v1 = vld [vmem:[%s454_s0 + $0x28] sm:$0xff]  ;;  %v23_v5 = vld [vmem:[%s454_s0 + $0x38] sm:$0xff]  ;;  %v20_v7 = vld [vmem:[%s454_s0 + $0x20] sm:$0xff]  ;;  %283 = vset.pattern.permute.xlu0 %v285_v8 }
   0x3   :  { %v249_v4 = vpack.c.bf16 %v21_v1, %v17_v0  ;;  %v265_v9 = vpack.c.bf16 %v23_v5, %v19_v2  ;;  %v251_v10 = vpack.c.bf16 %v20_v7, %v16_v6  ;;  %v18_v11 = vld [vmem:[%s454_s0 + $0x10] sm:$0xff]  ;;  %v25_v13 = vld [vmem:[%s454_s0 + $0x48] sm:$0xff]  ;;  %v27_v16 = vld [vmem:[%s454_s0 + $0x58] sm:$0xff] }
   0x4   :  { %v22_v12 = vld [vmem:[%s454_s0 + $0x30] sm:$0xff]  ;;  %v29_v15 = vld [vmem:[%s454_s0 + $0x68] sm:$0xff]  ;;  %v31_v17 = vld [vmem:[%s454_s0 + $0x78] sm:$0xff] }
   0x5   :  { %250 = vmatprep.subr.bf16.mxu0 %v249_v4  ;;  %v267_v14 = vpack.c.bf16 %v22_v12, %v18_v11  ;;  %266 = vmatprep.subr.bf16.mxu1 %v265_v9  ;;  %v253_v18 = vpack.c.bf16 %v29_v15, %v25_v13  ;;  %v269_v19 = vpack.c.bf16 %v31_v17, %v27_v16  ;;  %v24_v20 = vld [vmem:[%s454_s0 + $0x40] sm:$0xff]  ;;  %v26_v22 = vld [vmem:[%s454_s0 + $0x50] sm:$0xff]  ;;  %v33_v25 = vld [vmem:[%s454_s0 + $0x88] sm:$0xff] }
   0x6   :  { %252 = vmatpush1.bf16.msra.mxu0 %v251_v10  ;;  %v28_v21 = vld [vmem:[%s454_s0 + $0x60] sm:$0xff]  ;;  %v30_v24 = vld [vmem:[%s454_s0 + $0x70] sm:$0xff]  ;;  %v37_v26 = vld [vmem:[%s454_s0 + $0xa8] sm:$0xff] }
   0x7   :  { %268 = vmatpush1.bf16.msra.mxu1 %v267_v14  ;;  %v255_v23 = vpack.c.bf16 %v28_v21, %v24_v20  ;;  %254 = vmatprep.subr.bf16.mxu0 %v253_v18  ;;  %v271_v27 = vpack.c.bf16 %v30_v24, %v26_v22  ;;  %v257_v28 = vpack.c.bf16 %v37_v26, %v33_v25  ;;  %v35_v29 = vld [vmem:[%s454_s0 + $0x98] sm:$0xff]  ;;  %v32_v31 = vld [vmem:[%s454_s0 + $0x80] sm:$0xff]  ;;  %v34_v34 = vld [vmem:[%s454_s0 + $0x90] sm:$0xff] }
   0x8   :  { %270 = vmatprep.subr.bf16.mxu1 %v269_v19  ;;  %v39_v30 = vld [vmem:[%s454_s0 + $0xb8] sm:$0xff]  ;;  %v36_v33 = vld [vmem:[%s454_s0 + $0xa0] sm:$0xff]  ;;  %v38_v35 = vld [vmem:[%s454_s0 + $0xb0] sm:$0xff] }
   0x9   :  { %v273_v32 = vpack.c.bf16 %v39_v30, %v35_v29  ;;  %v259_v36 = vpack.c.bf16 %v36_v33, %v32_v31  ;;  %v41_v37 = vld [vmem:[%s454_s0 + $0xc8] sm:$0xff]  ;;  %v43_v39 = vld [vmem:[%s454_s0 + $0xd8] sm:$0xff]  ;;  %v275_v40 = vpack.c.bf16 %v38_v35, %v34_v34  ;;  %v40_v43 = vld [vmem:[%s454_s0 + $0xc0] sm:$0xff] }
   0xa   :  { %256 = vmatpush1.bf16.msra.mxu0 %v255_v23  ;;  %v45_v38 = vld [vmem:[%s454_s0 + $0xe8] sm:$0xff]  ;;  %v47_v42 = vld [vmem:[%s454_s0 + $0xf8] sm:$0xff]  ;;  %v44_v44 = vld [vmem:[%s454_s0 + $0xe0] sm:$0xff] }
   0xb   :  { %272 = vmatpush1.bf16.msra.mxu1 %v271_v27  ;;  %258 = vmatprep.subr.bf16.mxu0 %v257_v28  ;;  %v261_v41 = vpack.c.bf16 %v45_v38, %v41_v37  ;;  %v277_v45 = vpack.c.bf16 %v47_v42, %v43_v39  ;;  %v42_v46 = vld [vmem:[%s454_s0 + $0xd0] sm:$0xff]  ;;  %v263_v48 = vpack.c.bf16 %v44_v44, %v40_v43  ;;  %v52_v49 = vld [vmem:[%s455_s2] sm:$0xff]  ;;  %v49_v51 = vld [vmem:[%s454_s0 + $0x108] sm:$0xff] }
   0xc   :  { %274 = vmatprep.subr.bf16.mxu1 %v273_v32  ;;  %v46_v47 = vld [vmem:[%s454_s0 + $0xf0] sm:$0xff]  ;;  %56 = vperm.xlu0 %283, %v52_v49   ;;  %v51_v52 = vld [vmem:[%s454_s0 + $0x118] sm:$0xff]  ;;  %v53_v53 = vld [vmem:[%s455_s2 + $0x8] sm:$0xff] }
   0xd   :  { %v279_v50 = vpack.c.bf16 %v46_v47, %v42_v46  ;;  %v48_v54 = vld [vmem:[%s454_s0 + $0x100] sm:$0xff]  ;;  %v50_v55 = vld [vmem:[%s454_s0 + $0x110] sm:$0xff]  ;;  %v15_v57 = vld [vmem:[%s456_s1 + $0x8] sm:$0xff] }
   0xe   :  { %260 = vmatpush1.bf16.msra.mxu0 %v259_v36  ;;  %v14_v56 = vld [vmem:[%s456_s1] sm:$0xff] }
   0xf   :  { %276 = vmatpush1.bf16.msra.mxu1 %v275_v40  ;;  %262 = vmatprep.subr.bf16.mxu0 %v261_v41 }
  0x10   :  { %278 = vmatprep.subr.bf16.mxu1 %v277_v45  ;;  %61 = vperm.xlu0 %283, %v53_v53  }
  0x12   :  { %264 = vmatpush1.bf16.msra.mxu0 %v263_v48 }
  0x13   :  { %280 = vmatpush1.bf16.msra.mxu1 %v279_v50  ;;  %87 = vmatprep.subr.mxu0 %v49_v51 }
  0x14   :  { %164 = vmatprep.subr.mxu1 %v51_v52 }
  0x16   :  { %88 = vmatpush1.msra.mxu0 %v48_v54 }
  0x17   :  { %165 = vmatpush1.msra.mxu1 %v50_v55  ;;  %245 = vmatmul.mubr.msk.f32.vlgmr.msra.gmra.mrb[0].mxu0 %vm64_vm0, %v14_v56 }
  0x18   :  { %247 = vmatmul.mubr.msk.f32.vlgmr.msra.gmra.mrb[0].mxu1 %vm64_vm0, %v14_v56  ;;  %141 = vmatprep.mubr.f32.mxu0 %v284_v3 }
  0x19   :  { %218 = vmatprep.mubr.f32.mxu1 %v284_v3 }
  0x1b   :  { %246 = vmatmul.mubr.msk.f32.gmra.mrb[2].mxu0 %vm64_vm0, %v15_v57 }
  0x1c   :  { %248 = vmatmul.mubr.msk.f32.gmra.mrb[2].mxu1 %vm64_vm0, %v15_v57 }
  0x8b   :  { %v57_v58 = vpop.permute.xlu0 %56 }
  0x8f   :  { %v62_v6 = vpop.permute.xlu0 %61 }
  0xea   :  { %v137_v59 = vpop.f32.mrb[0].mxu0 }
  0xeb   :  { %v138_v60 = vadd.f32 %v137_v59, %v57_v58  ;;  %v214_v61 = vpop.f32.mrb[0].mxu1  ;;  %v139_v62 = vpop.f32.mrb[1].mxu0 }
  0xec   :  { %v215_v63 = vadd.f32 %v214_v61, %v57_v58  ;;  %v140_v0 = vadd.f32 %v139_v62, %v57_v58  ;;  %v216_v1 = vpop.f32.mrb[1].mxu1 }
  0xed   :  { %v225_v2 = vmax.f32 %v138_v60, 0.0  ;;  %v217_v4 = vadd.f32 %v216_v1, %v57_v58 }
  0xee   :  { %v227_v5 = vmax.f32 %v215_v63, 0.0  ;;  %v226_v7 = vmax.f32 %v140_v0, 0.0  ;;  %v143_v8 = vpop.f32.mrb[2].mxu0 }
  0xef   :  { %233 = vst [vmem:[%s457_s3] sm:$0xff] %v225_v2  ;;  %v228_v3 = vmax.f32 %v217_v4, 0.0  ;;  %v144_v9 = vadd.f32 %v143_v8, %v62_v6  ;;  %v220_v10 = vpop.f32.mrb[2].mxu1  ;;  %v145_v11 = vpop.f32.mrb[3].mxu0 }
  0xf0   :  { %235 = vst [vmem:[%s457_s3 + $0x10] sm:$0xff] %v227_v5  ;;  %234 = vst [vmem:[%s457_s3 + $0x8] sm:$0xff] %v226_v7  ;;  %v221_v12 = vadd.f32 %v220_v10, %v62_v6  ;;  %v146_v13 = vadd.f32 %v145_v11, %v62_v6  ;;  %v222_v14 = vpop.f32.mrb[3].mxu1 }
  0xf1   :  { %236 = vst [vmem:[%s457_s3 + $0x18] sm:$0xff] %v228_v3  ;;  %v229_v15 = vmax.f32 %v144_v9, 0.0  ;;  %v223_v16 = vadd.f32 %v222_v14, %v62_v6 }
  0xf2   :  { %v231_v17 = vmax.f32 %v221_v12, 0.0  ;;  %v230_v18 = vmax.f32 %v146_v13, 0.0 }
  0xf3   :  { %237 = vst [vmem:[%s457_s3 + $0x20] sm:$0xff] %v229_v15  ;;  %v232_v19 = vmax.f32 %v223_v16, 0.0 }
  0xf4   :  { %239 = vst [vmem:[%s457_s3 + $0x30] sm:$0xff] %v231_v17  ;;  %238 = vst [vmem:[%s457_s3 + $0x28] sm:$0xff] %v230_v18 }
  0xf5   :  { %240 = vst [vmem:[%s457_s3 + $0x38] sm:$0xff] %v232_v19 }

// kernel: ident_net.6
= control target key start
LH: loop header
LB: loop body
LE: loop exit
PB: predicated region body
PF: predicated region fallthrough
CT: control target
= control target key end

     0   :  { %v188_v0 = vmov 0.0|0.0   ;;  %v189_v6 = vmov 0   ;;  %vm48_vm0 = vcmask 130048   ;;  %s306_s0 = inlined_call_operand.vmem [shape: f32[144,128], index: 0, kind: input, shape index: {}]   ;;  %s307_s1 = inlined_call_operand.vmem [shape: f32[16,144], index: 1, kind: input, shape index: {}]   ;;  %s308_s2 = inlined_call_operand.vmem [shape: f32[16,1], index: 2, kind: input, shape index: {}]   ;;  %s309_s3 = inlined_call_operand.vmem [shape: f32[16,128], index: 3, kind: output, shape index: {}]  }
   0x1   :  { %140 = vmatprep.subr.bf16.mxu0 %v188_v0  ;;  %167 = vmatprep.subr.bf16.mxu1 %v188_v0  ;;  %v18_v1 = vld [vmem:[%s306_s0] sm:$0xff]  ;;  %v19_v2 = vld [vmem:[%s306_s0 + $0x8] sm:$0xff]  ;;  %v20_v3 = vld [vmem:[%s306_s0 + $0x10] sm:$0xff] }
   0x2   :  { %v141_v4 = vpack.c.bf16 %v19_v2, %v18_v1  ;;  %v21_v5 = vld [vmem:[%s306_s0 + $0x18] sm:$0xff]  ;;  %187 = vset.pattern.permute.xlu0 %v189_v6  ;;  %v22_v8 = vld [vmem:[%s306_s0 + $0x20] sm:$0xff]  ;;  %v23_v9 = vld [vmem:[%s306_s0 + $0x28] sm:$0xff] }
   0x3   :  { %v144_v7 = vpack.c.bf16 %v21_v5, %v20_v3  ;;  %v15_v10 = vld [vmem:[%s307_s1 + $0x8] sm:$0xff]  ;;  %v17_v11 = vld [vmem:[%s307_s1 + $0x18] sm:$0xff]  ;;  %v147_v12 = vpack.c.bf16 %v23_v9, %v22_v8  ;;  %v36_v13 = vld [vmem:[%s308_s2] sm:$0xff] }
   0x4   :  { %142 = vmatpush1.bf16.msra.mxu0 %v141_v4  ;;  %176 = vmatpush1.bf16.msra.mxu1 %v141_v4  ;;  %v24_v14 = vld [vmem:[%s306_s0 + $0x30] sm:$0xff]  ;;  %v25_v15 = vld [vmem:[%s306_s0 + $0x38] sm:$0xff]  ;;  %v37_v17 = vld [vmem:[%s308_s2 + $0x8] sm:$0xff] }
   0x5   :  { %143 = vmatprep.subr.bf16.mxu0 %v188_v0  ;;  %168 = vmatprep.subr.bf16.mxu1 %v188_v0  ;;  %v150_v16 = vpack.c.bf16 %v25_v15, %v24_v14  ;;  %v26_v18 = vld [vmem:[%s306_s0 + $0x40] sm:$0xff]  ;;  %v27_v19 = vld [vmem:[%s306_s0 + $0x48] sm:$0xff]  ;;  %v28_v21 = vld [vmem:[%s306_s0 + $0x50] sm:$0xff] }
   0x6   :  { %138 = vmatprep.mubr.msk.f32.mxu0 %vm48_vm0, %v15_v10  ;;  %139 = vmatprep.mubr.msk.f32.mxu1 %vm48_vm0, %v17_v11  ;;  %v153_v20 = vpack.c.bf16 %v27_v19, %v26_v18  ;;  %v29_v22 = vld [vmem:[%s306_s0 + $0x58] sm:$0xff]  ;;  %v30_v24 = vld [vmem:[%s306_s0 + $0x60] sm:$0xff]  ;;  %v31_v25 = vld [vmem:[%s306_s0 + $0x68] sm:$0xff] }
   0x7   :  { %40 = vperm.xlu0 %187, %v36_v13   ;;  %v156_v23 = vpack.c.bf16 %v29_v22, %v28_v21  ;;  %v159_v26 = vpack.c.bf16 %v31_v25, %v30_v24  ;;  %v32_v27 = vld [vmem:[%s306_s0 + $0x70] sm:$0xff]  ;;  %v33_v28 = vld [vmem:[%s306_s0 + $0x78] sm:$0xff]  ;;  %v34_v30 = vld [vmem:[%s306_s0 + $0x80] sm:$0xff] }
   0x8   :  { %145 = vmatpush1.bf16.msra.mxu0 %v144_v7  ;;  %177 = vmatpush1.bf16.msra.mxu1 %v144_v7  ;;  %v162_v29 = vpack.c.bf16 %v33_v28, %v32_v27  ;;  %v35_v31 = vld [vmem:[%s306_s0 + $0x88] sm:$0xff]  ;;  %v14_v33 = vld [vmem:[%s307_s1] sm:$0xff]  ;;  %v16_v34 = vld [vmem:[%s307_s1 + $0x10] sm:$0xff] }
   0x9   :  { %146 = vmatprep.subr.bf16.mxu0 %v188_v0  ;;  %169 = vmatprep.subr.bf16.mxu1 %v188_v0  ;;  %v165_v32 = vpack.c.bf16 %v35_v31, %v34_v30 }
   0xb   :  { %45 = vperm.xlu0 %187, %v37_v17  }
   0xc   :  { %148 = vmatpush1.bf16.msra.mxu0 %v147_v12  ;;  %178 = vmatpush1.bf16.msra.mxu1 %v147_v12 }
   0xd   :  { %149 = vmatprep.subr.bf16.mxu0 %v188_v0  ;;  %170 = vmatprep.subr.bf16.mxu1 %v188_v0 }
  0x10   :  { %151 = vmatpush1.bf16.msra.mxu0 %v150_v16  ;;  %179 = vmatpush1.bf16.msra.mxu1 %v150_v16 }
  0x11   :  { %152 = vmatprep.subr.bf16.mxu0 %v188_v0  ;;  %171 = vmatprep.subr.bf16.mxu1 %v188_v0 }
  0x14   :  { %154 = vmatpush1.bf16.msra.mxu0 %v153_v20  ;;  %180 = vmatpush1.bf16.msra.mxu1 %v153_v20 }
  0x15   :  { %155 = vmatprep.subr.bf16.mxu0 %v188_v0  ;;  %172 = vmatprep.subr.bf16.mxu1 %v188_v0 }
  0x18   :  { %157 = vmatpush1.bf16.msra.mxu0 %v156_v23  ;;  %181 = vmatpush1.bf16.msra.mxu1 %v156_v23 }
  0x19   :  { %158 = vmatprep.subr.bf16.mxu0 %v188_v0  ;;  %173 = vmatprep.subr.bf16.mxu1 %v188_v0 }
  0x1c   :  { %160 = vmatpush1.bf16.msra.mxu0 %v159_v26  ;;  %182 = vmatpush1.bf16.msra.mxu1 %v159_v26 }
  0x1d   :  { %161 = vmatprep.subr.bf16.mxu0 %v188_v0  ;;  %174 = vmatprep.subr.bf16.mxu1 %v188_v0 }
  0x20   :  { %163 = vmatpush1.bf16.msra.mxu0 %v162_v29  ;;  %183 = vmatpush1.bf16.msra.mxu1 %v162_v29 }
  0x21   :  { %164 = vmatprep.subr.bf16.mxu0 %v188_v0  ;;  %175 = vmatprep.subr.bf16.mxu1 %v188_v0 }
  0x24   :  { %166 = vmatpush1.bf16.msra.mxu0 %v165_v32  ;;  %184 = vmatpush1.bf16.msra.mxu1 %v165_v32 }
  0x27   :  { %120 = vmatmul.mubr.f32.vlgmr.msra.gmra.mrb[0].mxu0 %v14_v33  ;;  %125 = vmatmul.mubr.f32.vlgmr.msra.gmra.mrb[0].mxu1 %v16_v34 }
  0x86   :  { %v41_v35 = vpop.permute.xlu0 %40 }
  0x8a   :  { %v46_v36 = vpop.permute.xlu0 %45 }
  0xfa   :  { %v121_v37 = vpop.f32.mrb[0].mxu0  ;;  %v126_v38 = vpop.f32.mrb[0].mxu1 }
  0xfb   :  { %v122_v39 = vadd.f32 %v121_v37, %v41_v35  ;;  %v127_v40 = vadd.f32 %v126_v38, %v46_v36  ;;  %v123_v41 = vpop.f32.mrb[1].mxu0  ;;  %v128_v42 = vpop.f32.mrb[1].mxu1 }
  0xfd   :  { %v130_v43 = vmax.f32 %v122_v39, 0.0  ;;  %v131_v44 = vmax.f32 %v127_v40, 0.0 }
  0xff   :  { %132 = vst [vmem:[%s309_s3] sm:$0xff] %v130_v43  ;;  %133 = vst [vmem:[%s309_s3 + $0x8] sm:$0xff] %v131_v44 }

// kernel: ident_net.7
= control target key start
LH: loop header
LB: loop body
LE: loop exit
PB: predicated region body
PF: predicated region fallthrough
CT: control target
= control target key end

     0   :  { %v3056_v3 = vmov 0   ;;  %vm118_vm0 = vcmask 130048   ;;  %vm974_vm1 = vcmask 261120   ;;  %vm3059_vm2 = vmmov 0   ;;  %s4417_s0 = inlined_call_operand.vmem [shape: f32[144,512], index: 0, kind: input, shape index: {}]   ;;  %s4418_s1 = inlined_call_operand.vmem [shape: f32[32,144], index: 1, kind: input, shape index: {}]   ;;  %s4419_s2 = inlined_call_operand.vmem [shape: f32[32,1], index: 2, kind: input, shape index: {}]   ;;  %s4420_s4 = inlined_call_operand.vmem [shape: f32[32,1], index: 4, kind: input, shape index: {}]   ;;  %s4421_s9 = inlined_call_operand.vmem [shape: f32[128,1152], index: 9, kind: input, shape index: {}]   ;;  %s4422_s6 = inlined_call_operand.vmem [shape: f32[64,1], index: 6, kind: input, shape index: {}]   ;;  %s4423_s8 = inlined_call_operand.vmem [shape: f32[2,1], index: 8, kind: input, shape index: {}]   ;;  %s4424_s3 = inlined_call_operand.vmem [shape: f32[32,288], index: 3, kind: input, shape index: {}]   ;;  %s4425_s5 = inlined_call_operand.vmem [shape: f32[64,288], index: 5, kind: input, shape index: {}]   ;;  %s4426_s10 = inlined_call_operand.vmem [shape: f32[128,2], index: 10, kind: input, shape index: {}]   ;;  %s4427_s7 = inlined_call_operand.vmem [shape: f32[2,64], index: 7, kind: input, shape index: {}]   ;;  %s4428_s11 = inlined_call_operand.vmem [shape: f32[2,2], index: 11, kind: output, shape index: {}]  }
   0x1   :  { %v47_v0 = vld [vmem:[%s4417_s0 + $0x8] sm:$0xff]  ;;  %v46_v2 = vld [vmem:[%s4417_s0] sm:$0xff]  ;;  %3050 = vset.pattern.permute.xlu0 %v3056_v3  ;;  %3051 = vset.pattern.permute.xlu1 %v3056_v3  ;;  %v49_v6 = vld [vmem:[%s4417_s0 + $0x18] sm:$0xff]  ;;  %vm2044_vm3 = vcmask 523264   ;;  %vm2118_vm4 = vcmask 9216  }
   0x2   :  { %v51_v1 = vld [vmem:[%s4417_s0 + $0x28] sm:$0xff]  ;;  %v50_v5 = vld [vmem:[%s4417_s0 + $0x20] sm:$0xff]  ;;  %v53_v7 = vld [vmem:[%s4417_s0 + $0x38] sm:$0xff] }
   0x3   :  { %v2530_v4 = vpack.c.bf16 %v51_v1, %v47_v0  ;;  %v2532_v8 = vpack.c.bf16 %v50_v5, %v46_v2  ;;  %v2566_v9 = vpack.c.bf16 %v53_v7, %v49_v6  ;;  %v48_v10 = vld [vmem:[%s4417_s0 + $0x10] sm:$0xff]  ;;  %v55_v12 = vld [vmem:[%s4417_s0 + $0x48] sm:$0xff]  ;;  %v54_v15 = vld [vmem:[%s4417_s0 + $0x40] sm:$0xff] }
   0x4   :  { %v52_v11 = vld [vmem:[%s4417_s0 + $0x30] sm:$0xff]  ;;  %v59_v14 = vld [vmem:[%s4417_s0 + $0x68] sm:$0xff]  ;;  %v58_v16 = vld [vmem:[%s4417_s0 + $0x60] sm:$0xff] }
   0x5   :  { %2531 = vmatprep.subr.bf16.mxu0 %v2530_v4  ;;  %v2568_v13 = vpack.c.bf16 %v52_v11, %v48_v10  ;;  %2567 = vmatprep.subr.bf16.mxu1 %v2566_v9  ;;  %v2534_v17 = vpack.c.bf16 %v59_v14, %v55_v12  ;;  %v2536_v18 = vpack.c.bf16 %v58_v16, %v54_v15  ;;  %v57_v19 = vld [vmem:[%s4417_s0 + $0x58] sm:$0xff]  ;;  %v56_v21 = vld [vmem:[%s4417_s0 + $0x50] sm:$0xff]  ;;  %v63_v24 = vld [vmem:[%s4417_s0 + $0x88] sm:$0xff] }
   0x6   :  { %2533 = vmatpush1.bf16.msra.mxu0 %v2532_v8  ;;  %v61_v20 = vld [vmem:[%s4417_s0 + $0x78] sm:$0xff]  ;;  %v60_v23 = vld [vmem:[%s4417_s0 + $0x70] sm:$0xff]  ;;  %v67_v25 = vld [vmem:[%s4417_s0 + $0xa8] sm:$0xff] }
   0x7   :  { %2569 = vmatpush1.bf16.msra.mxu1 %v2568_v13  ;;  %v2570_v22 = vpack.c.bf16 %v61_v20, %v57_v19  ;;  %2535 = vmatprep.subr.bf16.mxu0 %v2534_v17  ;;  %v2572_v26 = vpack.c.bf16 %v60_v23, %v56_v21  ;;  %v2538_v27 = vpack.c.bf16 %v67_v25, %v63_v24  ;;  %v62_v28 = vld [vmem:[%s4417_s0 + $0x80] sm:$0xff]  ;;  %v65_v30 = vld [vmem:[%s4417_s0 + $0x98] sm:$0xff]  ;;  %v64_v32 = vld [vmem:[%s4417_s0 + $0x90] sm:$0xff] }
   0x8   :  { %v66_v29 = vld [vmem:[%s4417_s0 + $0xa0] sm:$0xff]  ;;  %v69_v31 = vld [vmem:[%s4417_s0 + $0xb8] sm:$0xff]  ;;  %v68_v33 = vld [vmem:[%s4417_s0 + $0xb0] sm:$0xff] }
   0x9   :  { %2571 = vmatprep.subr.bf16.mxu1 %v2570_v22  ;;  %v2540_v34 = vpack.c.bf16 %v66_v29, %v62_v28  ;;  %v2574_v35 = vpack.c.bf16 %v69_v31, %v65_v30  ;;  %v71_v36 = vld [vmem:[%s4417_s0 + $0xc8] sm:$0xff]  ;;  %v70_v38 = vld [vmem:[%s4417_s0 + $0xc0] sm:$0xff]  ;;  %v2576_v39 = vpack.c.bf16 %v68_v33, %v64_v32  ;;  %v73_v42 = vld [vmem:[%s4417_s0 + $0xd8] sm:$0xff] }
   0xa   :  { %2537 = vmatpush1.bf16.msra.mxu0 %v2536_v18  ;;  %v75_v37 = vld [vmem:[%s4417_s0 + $0xe8] sm:$0xff]  ;;  %v74_v41 = vld [vmem:[%s4417_s0 + $0xe0] sm:$0xff]  ;;  %v77_v43 = vld [vmem:[%s4417_s0 + $0xf8] sm:$0xff] }
   0xb   :  { %2573 = vmatpush1.bf16.msra.mxu1 %v2572_v26  ;;  %2539 = vmatprep.subr.bf16.mxu0 %v2538_v27  ;;  %v2542_v40 = vpack.c.bf16 %v75_v37, %v71_v36  ;;  %v2578_v44 = vpack.c.bf16 %v77_v43, %v73_v42  ;;  %v72_v45 = vld [vmem:[%s4417_s0 + $0xd0] sm:$0xff]  ;;  %v79_v47 = vld [vmem:[%s4417_s0 + $0x108] sm:$0xff]  ;;  %v2544_v49 = vpack.c.bf16 %v74_v41, %v70_v38  ;;  %v81_v50 = vld [vmem:[%s4417_s0 + $0x118] sm:$0xff] }
   0xc   :  { %2575 = vmatprep.subr.bf16.mxu1 %v2574_v35  ;;  %v76_v46 = vld [vmem:[%s4417_s0 + $0xf0] sm:$0xff]  ;;  %v83_v48 = vld [vmem:[%s4417_s0 + $0x128] sm:$0xff]  ;;  %v85_v51 = vld [vmem:[%s4417_s0 + $0x138] sm:$0xff] }
   0xd   :  { %v2580_v52 = vpack.c.bf16 %v76_v46, %v72_v45  ;;  %v2546_v53 = vpack.c.bf16 %v83_v48, %v79_v47  ;;  %v78_v54 = vld [vmem:[%s4417_s0 + $0x100] sm:$0xff]  ;;  %v80_v56 = vld [vmem:[%s4417_s0 + $0x110] sm:$0xff]  ;;  %v2582_v57 = vpack.c.bf16 %v85_v51, %v81_v50  ;;  %v87_v59 = vld [vmem:[%s4417_s0 + $0x148] sm:$0xff] }
   0xe   :  { %2541 = vmatpush1.bf16.msra.mxu0 %v2540_v34  ;;  %v82_v55 = vld [vmem:[%s4417_s0 + $0x120] sm:$0xff]  ;;  %v84_v58 = vld [vmem:[%s4417_s0 + $0x130] sm:$0xff]  ;;  %v91_v60 = vld [vmem:[%s4417_s0 + $0x168] sm:$0xff] }
   0xf   :  { %2577 = vmatpush1.bf16.msra.mxu1 %v2576_v39  ;;  %2543 = vmatprep.subr.bf16.mxu0 %v2542_v40  ;;  %v89_v61 = vld [vmem:[%s4417_s0 + $0x158] sm:$0xff]  ;;  %v2548_v63 = vpack.c.bf16 %v82_v55, %v78_v54  ;;  %v2584_v0 = vpack.c.bf16 %v84_v58, %v80_v56  ;;  %v2550_v1 = vpack.c.bf16 %v91_v60, %v87_v59  ;;  %v86_v2 = vld [vmem:[%s4417_s0 + $0x140] sm:$0xff]  ;;  %v88_v4 = vld [vmem:[%s4417_s0 + $0x150] sm:$0xff] }
  0x10   :  { %2579 = vmatprep.subr.bf16.mxu1 %v2578_v44  ;;  %v93_v62 = vld [vmem:[%s4417_s0 + $0x178] sm:$0xff]  ;;  %v90_v3 = vld [vmem:[%s4417_s0 + $0x160] sm:$0xff]  ;;  %v92_v6 = vld [vmem:[%s4417_s0 + $0x170] sm:$0xff] }
  0x11   :  { %v2586_v5 = vpack.c.bf16 %v93_v62, %v89_v61  ;;  %v95_v7 = vld [vmem:[%s4417_s0 + $0x188] sm:$0xff]  ;;  %v97_v9 = vld [vmem:[%s4417_s0 + $0x198] sm:$0xff]  ;;  %v2552_v11 = vpack.c.bf16 %v90_v3, %v86_v2  ;;  %v2588_v12 = vpack.c.bf16 %v92_v6, %v88_v4  ;;  %v94_v14 = vld [vmem:[%s4417_s0 + $0x180] sm:$0xff] }
  0x12   :  { %2545 = vmatpush1.bf16.msra.mxu0 %v2544_v49  ;;  %v99_v8 = vld [vmem:[%s4417_s0 + $0x1a8] sm:$0xff]  ;;  %v101_v10 = vld [vmem:[%s4417_s0 + $0x1b8] sm:$0xff]  ;;  %v98_v15 = vld [vmem:[%s4417_s0 + $0x1a0] sm:$0xff] }
  0x13   :  { %2581 = vmatpush1.bf16.msra.mxu1 %v2580_v52  ;;  %2547 = vmatprep.subr.bf16.mxu0 %v2546_v53  ;;  %v2554_v13 = vpack.c.bf16 %v99_v8, %v95_v7  ;;  %v96_v16 = vld [vmem:[%s4417_s0 + $0x190] sm:$0xff]  ;;  %v2590_v17 = vpack.c.bf16 %v101_v10, %v97_v9  ;;  %v103_v19 = vld [vmem:[%s4417_s0 + $0x1c8] sm:$0xff]  ;;  %v105_v21 = vld [vmem:[%s4417_s0 + $0x1d8] sm:$0xff]  ;;  %v2556_v24 = vpack.c.bf16 %v98_v15, %v94_v14 }
  0x14   :  { %2583 = vmatprep.subr.bf16.mxu1 %v2582_v57  ;;  %v100_v18 = vld [vmem:[%s4417_s0 + $0x1b0] sm:$0xff]  ;;  %v107_v20 = vld [vmem:[%s4417_s0 + $0x1e8] sm:$0xff]  ;;  %v109_v22 = vld [vmem:[%s4417_s0 + $0x1f8] sm:$0xff] }
  0x15   :  { %v39_v23 = vld [vmem:[%s4418_s1 + $0x8] sm:$0xff]  ;;  %v102_v25 = vld [vmem:[%s4417_s0 + $0x1c0] sm:$0xff]  ;;  %v2592_v26 = vpack.c.bf16 %v100_v18, %v96_v16  ;;  %v2558_v27 = vpack.c.bf16 %v107_v20, %v103_v19  ;;  %v104_v29 = vld [vmem:[%s4417_s0 + $0x1d0] sm:$0xff]  ;;  %v2594_v31 = vpack.c.bf16 %v109_v22, %v105_v21 }
  0x16   :  { %2549 = vmatpush1.bf16.msra.mxu0 %v2548_v63  ;;  %2143 = vmatprep.mubr.msk.f32.mxu0 %vm118_vm0, %v39_v23  ;;  %v106_v28 = vld [vmem:[%s4417_s0 + $0x1e0] sm:$0xff]  ;;  %v108_v30 = vld [vmem:[%s4417_s0 + $0x1f0] sm:$0xff]  ;;  %v111_v32 = vld [vmem:[%s4417_s0 + $0x208] sm:$0xff] }
  0x17   :  { %2585 = vmatpush1.bf16.msra.mxu1 %v2584_v0  ;;  %2551 = vmatprep.subr.bf16.mxu0 %v2550_v1  ;;  %v115_v33 = vld [vmem:[%s4417_s0 + $0x228] sm:$0xff]  ;;  %v321_v34 = vld [vmem:[%s4419_s2] sm:$0xff]  ;;  %v113_v35 = vld [vmem:[%s4417_s0 + $0x218] sm:$0xff]  ;;  %v2560_v37 = vpack.c.bf16 %v106_v28, %v102_v25  ;;  %v2596_v39 = vpack.c.bf16 %v108_v30, %v104_v29 }
  0x18   :  { %2587 = vmatprep.subr.bf16.mxu1 %v2586_v5  ;;  %2147 = vmatprep.mubr.msk.f32.mxu1 %vm118_vm0, %v39_v23  ;;  %v117_v36 = vld [vmem:[%s4417_s0 + $0x238] sm:$0xff]  ;;  %v322_v38 = vld [vmem:[%s4419_s2 + $0x8] sm:$0xff]  ;;  %v2562_v40 = vpack.c.bf16 %v115_v33, %v111_v32  ;;  %v110_v41 = vld [vmem:[%s4417_s0 + $0x200] sm:$0xff] }
  0x19   :  { %327 = vperm.xlu0 %3050, %v321_v34   ;;  %v114_v42 = vld [vmem:[%s4417_s0 + $0x220] sm:$0xff]  ;;  %v323_v43 = vld [vmem:[%s4419_s2 + $0x10] sm:$0xff]  ;;  %v2598_v44 = vpack.c.bf16 %v117_v36, %v113_v35  ;;  %v324_v47 = vld [vmem:[%s4419_s2 + $0x18] sm:$0xff] }
  0x1a   :  { %2553 = vmatpush1.bf16.msra.mxu0 %v2552_v11  ;;  %v112_v45 = vld [vmem:[%s4417_s0 + $0x210] sm:$0xff]  ;;  %337 = vperm.xlu1 %3051, %v323_v43   ;;  %v2564_v48 = vpack.c.bf16 %v114_v42, %v110_v41  ;;  %v950_v49 = vld [vmem:[%s4420_s4] sm:$0xff]  ;;  %v354_v50 = vld [vmem:[%s4421_s9 + $0x8] sm:$0xff] }
  0x1b   :  { %2589 = vmatpush1.bf16.msra.mxu1 %v2588_v12  ;;  %2555 = vmatprep.subr.bf16.mxu0 %v2554_v13  ;;  %v116_v46 = vld [vmem:[%s4417_s0 + $0x230] sm:$0xff]  ;;  %v356_v54 = vld [vmem:[%s4421_s9 + $0x18] sm:$0xff]  ;;  %v365_v55 = vld [vmem:[%s4421_s9 + $0x60] sm:$0xff] }
  0x1c   :  { %2591 = vmatprep.subr.bf16.mxu1 %v2590_v17  ;;  %v363_v51 = vld [vmem:[%s4421_s9 + $0x50] sm:$0xff]  ;;  %v2600_v52 = vpack.c.bf16 %v116_v46, %v112_v45  ;;  %v3370_v56 = vpack.c.bf16 %v365_v55, %v356_v54  ;;  %v353_v57 = vld [vmem:[%s4421_s9] sm:$0xff]  ;;  %v362_v58 = vld [vmem:[%s4421_s9 + $0x48] sm:$0xff] }
  0x1d   :  { %332 = vperm.xlu0 %3050, %v322_v38   ;;  %v3362_v53 = vpack.c.bf16 %v363_v51, %v354_v50  ;;  %v951_v59 = vld [vmem:[%s4420_s4 + $0x8] sm:$0xff]  ;;  %v355_v60 = vld [vmem:[%s4421_s9 + $0x10] sm:$0xff]  ;;  %v364_v61 = vld [vmem:[%s4421_s9 + $0x58] sm:$0xff]  ;;  %v3397_v1 = vpack.c.bf16 %v362_v58, %v353_v57 }
  0x1e   :  { %2557 = vmatpush1.bf16.msra.mxu0 %v2556_v24  ;;  %342 = vperm.xlu1 %3051, %v324_v47   ;;  %v38_v62 = vld [vmem:[%s4418_s1] sm:$0xff]  ;;  %v952_v63 = vld [vmem:[%s4420_s4 + $0x10] sm:$0xff]  ;;  %v41_v0 = vld [vmem:[%s4418_s1 + $0x18] sm:$0xff]  ;;  %v3400_v2 = vpack.c.bf16 %v364_v61, %v355_v60 }
  0x1f   :  { %2593 = vmatpush1.bf16.msra.mxu1 %v2592_v26  ;;  %2559 = vmatprep.subr.bf16.mxu0 %v2558_v27  ;;  %v372_v3 = vld [vmem:[%s4421_s9 + $0x98] sm:$0xff]  ;;  %v381_v4 = vld [vmem:[%s4421_s9 + $0xe0] sm:$0xff]  ;;  %v374_v6 = vld [vmem:[%s4421_s9 + $0xa8] sm:$0xff] }
  0x20   :  { %2595 = vmatprep.subr.bf16.mxu1 %v2594_v31  ;;  %v953_v5 = vld [vmem:[%s4420_s4 + $0x18] sm:$0xff]  ;;  %v383_v7 = vld [vmem:[%s4421_s9 + $0xf0] sm:$0xff]  ;;  %v1626_v9 = vld [vmem:[%s4422_s6] sm:$0xff]  ;;  %v3429_v11 = vpack.c.bf16 %v381_v4, %v372_v3 }
  0x21   :  { %956 = vperm.xlu0 %3050, %v950_v49   ;;  %v40_v8 = vld [vmem:[%s4418_s1 + $0x10] sm:$0xff]  ;;  %v43_v10 = vld [vmem:[%s4418_s1 + $0x28] sm:$0xff]  ;;  %v3432_v12 = vpack.c.bf16 %v383_v7, %v374_v6  ;;  %v380_v14 = vld [vmem:[%s4421_s9 + $0xd8] sm:$0xff] }
  0x22   :  { %2561 = vmatpush1.bf16.msra.mxu0 %v2560_v37  ;;  %961 = vperm.xlu1 %3051, %v951_v59   ;;  %v371_v13 = vld [vmem:[%s4421_s9 + $0x90] sm:$0xff]  ;;  %v1627_v15 = vld [vmem:[%s4422_s6 + $0x8] sm:$0xff]  ;;  %v373_v16 = vld [vmem:[%s4421_s9 + $0xa0] sm:$0xff] }
  0x23   :  { %2597 = vmatpush1.bf16.msra.mxu1 %v2596_v39  ;;  %2563 = vmatprep.subr.bf16.mxu0 %v2562_v40  ;;  %v382_v17 = vld [vmem:[%s4421_s9 + $0xe8] sm:$0xff]  ;;  %v42_v18 = vld [vmem:[%s4418_s1 + $0x20] sm:$0xff]  ;;  %v45_v19 = vld [vmem:[%s4418_s1 + $0x38] sm:$0xff]  ;;  %v3461_v21 = vpack.c.bf16 %v380_v14, %v371_v13 }
  0x24   :  { %2599 = vmatprep.subr.bf16.mxu1 %v2598_v44  ;;  %v1628_v20 = vld [vmem:[%s4422_s6 + $0x10] sm:$0xff]  ;;  %v390_v22 = vld [vmem:[%s4421_s9 + $0x128] sm:$0xff]  ;;  %v392_v24 = vld [vmem:[%s4421_s9 + $0x138] sm:$0xff]  ;;  %v3476_v26 = vpack.c.bf16 %v382_v17, %v373_v16 }
  0x25   :  { %966 = vperm.xlu0 %3050, %v952_v63   ;;  %v399_v23 = vld [vmem:[%s4421_s9 + $0x170] sm:$0xff]  ;;  %v401_v27 = vld [vmem:[%s4421_s9 + $0x180] sm:$0xff]  ;;  %v398_v29 = vld [vmem:[%s4421_s9 + $0x168] sm:$0xff] }
  0x26   :  { %2565 = vmatpush1.bf16.msra.mxu0 %v2564_v48  ;;  %971 = vperm.xlu1 %3051, %v953_v5   ;;  %v44_v25 = vld [vmem:[%s4418_s1 + $0x30] sm:$0xff]  ;;  %v389_v28 = vld [vmem:[%s4421_s9 + $0x120] sm:$0xff]  ;;  %v1629_v30 = vld [vmem:[%s4422_s6 + $0x18] sm:$0xff]  ;;  %v3500_v34 = vpack.c.bf16 %v399_v23, %v390_v22  ;;  %v3510_v37 = vpack.c.bf16 %v401_v27, %v392_v24 }
  0x27   :  { %2601 = vmatpush1.bf16.msra.mxu1 %v2600_v52  ;;  %2603 = vmatprep.subr.bf16.mxu0 %v3362_v53  ;;  %v391_v31 = vld [vmem:[%s4421_s9 + $0x130] sm:$0xff]  ;;  %v400_v32 = vld [vmem:[%s4421_s9 + $0x178] sm:$0xff]  ;;  %v1630_v33 = vld [vmem:[%s4422_s6 + $0x20] sm:$0xff]  ;;  %v3512_v38 = vpack.c.bf16 %v398_v29, %v389_v28 }
  0x28   :  { %2635 = vmatprep.subr.bf16.mxu1 %v3370_v56  ;;  %v408_v35 = vld [vmem:[%s4421_s9 + $0x1b8] sm:$0xff]  ;;  %v417_v36 = vld [vmem:[%s4421_s9 + $0x200] sm:$0xff]  ;;  %v410_v39 = vld [vmem:[%s4421_s9 + $0x1c8] sm:$0xff]  ;;  %v3521_v41 = vpack.c.bf16 %v400_v32, %v391_v31 }
  0x29   :  { %196 = vmatmul.mubr.f32.vlgmr.msra.gmra.mrb[0].mxu0 %v38_v62  ;;  %1636 = vperm.xlu0 %3050, %v1626_v9   ;;  %v419_v40 = vld [vmem:[%s4421_s9 + $0x210] sm:$0xff]  ;;  %v416_v43 = vld [vmem:[%s4421_s9 + $0x1f8] sm:$0xff]  ;;  %v1631_v44 = vld [vmem:[%s4422_s6 + $0x28] sm:$0xff]  ;;  %v3532_v45 = vpack.c.bf16 %v417_v36, %v408_v35 }
  0x2a   :  { %285 = vmatmul.mubr.f32.vlgmr.msra.gmra.mrb[0].mxu1 %v38_v62  ;;  %2144 = vmatprep.mubr.msk.f32.mxu0 %vm118_vm0, %v41_v0  ;;  %v407_v42 = vld [vmem:[%s4421_s9 + $0x1b0] sm:$0xff]  ;;  %v409_v46 = vld [vmem:[%s4421_s9 + $0x1c0] sm:$0xff]  ;;  %v418_v47 = vld [vmem:[%s4421_s9 + $0x208] sm:$0xff]  ;;  %v3544_v49 = vpack.c.bf16 %v419_v40, %v410_v39 }
  0x2b   :  { %2148 = vmatprep.mubr.msk.f32.mxu1 %vm118_vm0, %v41_v0  ;;  %2605 = vmatpush1.bf16.msra.mxu0 %v3397_v1  ;;  %v1632_v48 = vld [vmem:[%s4422_s6 + $0x30] sm:$0xff]  ;;  %v426_v50 = vld [vmem:[%s4421_s9 + $0x248] sm:$0xff]  ;;  %v1633_v52 = vld [vmem:[%s4422_s6 + $0x38] sm:$0xff]  ;;  %v3557_v54 = vpack.c.bf16 %v416_v43, %v407_v42  ;;  %v3566_v58 = vpack.c.bf16 %v418_v47, %v409_v46 }
  0x2c   :  { %2637 = vmatpush1.bf16.msra.mxu1 %v3400_v2  ;;  %2607 = vmatprep.subr.bf16.mxu0 %v3429_v11  ;;  %v435_v51 = vld [vmem:[%s4421_s9 + $0x290] sm:$0xff]  ;;  %v428_v55 = vld [vmem:[%s4421_s9 + $0x258] sm:$0xff]  ;;  %v437_v57 = vld [vmem:[%s4421_s9 + $0x2a0] sm:$0xff] }
  0x2d   :  { %202 = vmatmul.mubr.f32.gmra.mrb[2].mxu0 %v40_v8  ;;  %1641 = vperm.xlu1 %3051, %v1627_v15   ;;  %v425_v59 = vld [vmem:[%s4421_s9 + $0x240] sm:$0xff]  ;;  %v434_v60 = vld [vmem:[%s4421_s9 + $0x288] sm:$0xff]  ;;  %v427_v61 = vld [vmem:[%s4421_s9 + $0x250] sm:$0xff]  ;;  %v3578_v62 = vpack.c.bf16 %v435_v51, %v426_v50  ;;  %v3593_v5 = vpack.c.bf16 %v437_v57, %v428_v55 }
  0x2e   :  { %291 = vmatmul.mubr.f32.gmra.mrb[2].mxu1 %v40_v8  ;;  %2145 = vmatprep.mubr.msk.f32.mxu0 %vm118_vm0, %v43_v10  ;;  %v436_v63 = vld [vmem:[%s4421_s9 + $0x298] sm:$0xff]  ;;  %v453_v3 = vld [vmem:[%s4421_s9 + $0x320] sm:$0xff]  ;;  %v446_v6 = vld [vmem:[%s4421_s9 + $0x2e8] sm:$0xff]  ;;  %v3602_v8 = vpack.c.bf16 %v434_v60, %v425_v59 }
  0x2f   :  { %2149 = vmatprep.mubr.msk.f32.mxu1 %vm118_vm0, %v43_v10  ;;  %2639 = vmatprep.subr.bf16.mxu1 %v3432_v12  ;;  %v444_v0 = vld [vmem:[%s4421_s9 + $0x2d8] sm:$0xff]  ;;  %v2038_v4 = vld [vmem:[%s4423_s8] sm:$0x3]  ;;  %v455_v7 = vld [vmem:[%s4421_s9 + $0x330] sm:$0xff]  ;;  %v3605_v9 = vpack.c.bf16 %v436_v63, %v427_v61  ;;  %v4429_v63 = vmov 0.0  }
  0x30   :  { %1646 = vperm.xlu0 %3050, %v1628_v20   ;;  %2609 = vmatpush1.bf16.msra.mxu0 %v3461_v21  ;;  %v3607_v10 = vpack.c.bf16 %v453_v3, %v444_v0  ;;  %v3610_v13 = vpack.c.bf16 %v455_v7, %v446_v6  ;;  %v443_v14 = vld [vmem:[%s4421_s9 + $0x2d0] sm:$0xff]  ;;  %v452_v15 = vld [vmem:[%s4421_s9 + $0x318] sm:$0xff]  ;;  %v445_v16 = vld [vmem:[%s4421_s9 + $0x2e0] sm:$0xff] }
  0x31   :  { %208 = vmatmul.mubr.f32.gmra.mrb[4].mxu0 %v42_v18  ;;  %1651 = vperm.xlu1 %3051, %v1629_v30   ;;  %v3626_v17 = vpack.c.bf16 %v452_v15, %v443_v14  ;;  %v462_v20 = vld [vmem:[%s4421_s9 + $0x368] sm:$0xff]  ;;  %v471_v22 = vld [vmem:[%s4421_s9 + $0x3b0] sm:$0xff]  ;;  %v464_v23 = vld [vmem:[%s4421_s9 + $0x378] sm:$0xff] }
  0x32   :  { %2146 = vmatprep.mubr.msk.f32.mxu0 %vm118_vm0, %v45_v19  ;;  %297 = vmatmul.mubr.f32.gmra.mrb[4].mxu1 %v42_v18  ;;  %v454_v18 = vld [vmem:[%s4421_s9 + $0x328] sm:$0xff]  ;;  %v3644_v24 = vpack.c.bf16 %v471_v22, %v462_v20  ;;  %v461_v27 = vld [vmem:[%s4421_s9 + $0x360] sm:$0xff]  ;;  %v463_v31 = vld [vmem:[%s4421_s9 + $0x370] sm:$0xff] }
  0x33   :  { %2150 = vmatprep.mubr.msk.f32.mxu1 %vm118_vm0, %v45_v19  ;;  %2641 = vmatpush1.bf16.msra.mxu1 %v3476_v26  ;;  %v3631_v19 = vpack.c.bf16 %v454_v18, %v445_v16  ;;  %v470_v28 = vld [vmem:[%s4421_s9 + $0x3a8] sm:$0xff]  ;;  %v472_v32 = vld [vmem:[%s4421_s9 + $0x3b8] sm:$0xff]  ;;  %v489_v36 = vld [vmem:[%s4421_s9 + $0x440] sm:$0xff] }
  0x34   :  { %1656 = vperm.xlu0 %3050, %v1630_v33   ;;  %2611 = vmatprep.subr.bf16.mxu0 %v3500_v34  ;;  %v3657_v30 = vpack.c.bf16 %v470_v28, %v461_v27  ;;  %v3666_v33 = vpack.c.bf16 %v472_v32, %v463_v31  ;;  %v480_v35 = vld [vmem:[%s4421_s9 + $0x3f8] sm:$0xff]  ;;  %v482_v39 = vld [vmem:[%s4421_s9 + $0x408] sm:$0xff]  ;;  %v491_v42 = vld [vmem:[%s4421_s9 + $0x450] sm:$0xff] }
  0x35   :  { %214 = vmatmul.mubr.f32.gmra.mrb[6].mxu0 %v44_v25  ;;  %2643 = vmatprep.subr.bf16.mxu1 %v3510_v37  ;;  %v3680_v40 = vpack.c.bf16 %v489_v36, %v480_v35  ;;  %v479_v43 = vld [vmem:[%s4421_s9 + $0x3f0] sm:$0xff]  ;;  %v3691_v46 = vpack.c.bf16 %v491_v42, %v482_v39  ;;  %v490_v50 = vld [vmem:[%s4421_s9 + $0x448] sm:$0xff]  ;;  %v360_v57 = vld [vmem:[%s4421_s9 + $0x38] sm:$0xff] }
  0x36   :  { %303 = vmatmul.mubr.f32.gmra.mrb[6].mxu1 %v44_v25  ;;  %2613 = vmatpush1.bf16.msra.mxu0 %v3512_v38  ;;  %v473_v25 = vld [vmem:[%s4421_s9 + $0x3c0] sm:$0xff]  ;;  %v367_v55 = vld [vmem:[%s4421_s9 + $0x70] sm:$0xff]  ;;  %v366_v28 = vld [vmem:[%s4421_s9 + $0x68] sm:$0xff] }
  0x37   :  { %1661 = vperm.xlu1 %3051, %v1631_v44   ;;  %2645 = vmatpush1.bf16.msra.mxu1 %v3521_v41  ;;  %v3655_v29 = vpack.c.bf16 %v473_v25, %v464_v23  ;;  %v488_v44 = vld [vmem:[%s4421_s9 + $0x438] sm:$0xff]  ;;  %v369_v60 = vld [vmem:[%s4421_s9 + $0x80] sm:$0xff]  ;;  %v359_v31 = vld [vmem:[%s4421_s9 + $0x30] sm:$0xff] }
  0x38   :  { %1666 = vperm.xlu0 %3050, %v1632_v48   ;;  %2615 = vmatprep.subr.bf16.mxu0 %v3532_v45  ;;  %v3693_v47 = vpack.c.bf16 %v488_v44, %v479_v43  ;;  %v481_v48 = vld [vmem:[%s4421_s9 + $0x400] sm:$0xff]  ;;  %v3721_v61 = vpack.c.bf16 %v369_v60, %v360_v57  ;;  %v368_v32 = vld [vmem:[%s4421_s9 + $0x78] sm:$0xff]  ;;  %v378_v43 = vld [vmem:[%s4421_s9 + $0xc8] sm:$0xff] }
  0x39   :  { %2647 = vmatprep.subr.bf16.mxu1 %v3544_v49  ;;  %v3702_v51 = vpack.c.bf16 %v490_v50, %v481_v48  ;;  %561 = vmatprep.mubr.f32.mxu0 %v4429_v63  ;;  %v357_v22 = vld [vmem:[%s4421_s9 + $0x20] sm:$0xff]  ;;  %v376_v35 = vld [vmem:[%s4421_s9 + $0xb8] sm:$0xff]  ;;  %v387_v44 = vld [vmem:[%s4421_s9 + $0x110] sm:$0xff] }
  0x3a   :  { %2617 = vmatpush1.bf16.msra.mxu0 %v3557_v54  ;;  %650 = vmatprep.mubr.f32.mxu1 %v4429_v63  ;;  %v385_v42 = vld [vmem:[%s4421_s9 + $0x100] sm:$0xff]  ;;  %v3751_v50 = vpack.c.bf16 %v366_v28, %v357_v22  ;;  %v384_v57 = vld [vmem:[%s4421_s9 + $0xf8] sm:$0xff] }
  0x3b   :  { %1671 = vperm.xlu1 %3051, %v1633_v52   ;;  %2649 = vmatpush1.bf16.msra.mxu1 %v3566_v58  ;;  %v358_v52 = vld [vmem:[%s4421_s9 + $0x28] sm:$0xff]  ;;  %v377_v60 = vld [vmem:[%s4421_s9 + $0xc0] sm:$0xff]  ;;  %v3775_v22 = vpack.c.bf16 %v385_v42, %v376_v35 }
  0x3c   :  { %2041 = vperm.xlu0 %3050, %v2038_v4   ;;  %2619 = vmatprep.subr.bf16.mxu0 %v3578_v62  ;;  %v3716_v59 = vpack.c.bf16 %v367_v55, %v358_v52  ;;  %v3753_v52 = vpack.c.bf16 %v368_v32, %v359_v31  ;;  %v375_v55 = vld [vmem:[%s4421_s9 + $0xb0] sm:$0xff] }
  0x3d   :  { %2651 = vmatprep.subr.bf16.mxu1 %v3593_v5  ;;  %v3789_v35 = vpack.c.bf16 %v384_v57, %v375_v55  ;;  %v395_v57 = vld [vmem:[%s4421_s9 + $0x150] sm:$0xff] }
  0x3e   :  { %2621 = vmatpush1.bf16.msra.mxu0 %v3602_v8 }
  0x3f   :  { %2653 = vmatpush1.bf16.msra.mxu1 %v3605_v9  ;;  %2623 = vmatprep.subr.bf16.mxu0 %v3607_v10 }
  0x40   :  { %2655 = vmatprep.subr.bf16.mxu1 %v3610_v13 }
  0x42   :  { %2625 = vmatpush1.bf16.msra.mxu0 %v3626_v17 }
  0x43   :  { %2657 = vmatpush1.bf16.msra.mxu1 %v3631_v19  ;;  %2627 = vmatprep.subr.bf16.mxu0 %v3644_v24 }
  0x44   :  { %2659 = vmatprep.subr.bf16.mxu1 %v3655_v29 }
  0x46   :  { %2629 = vmatpush1.bf16.msra.mxu0 %v3657_v30 }
  0x47   :  { %2661 = vmatpush1.bf16.msra.mxu1 %v3666_v33  ;;  %2631 = vmatprep.subr.bf16.mxu0 %v3680_v40 }
  0x48   :  { %2663 = vmatprep.subr.bf16.mxu1 %v3691_v46 }
  0x4a   :  { %2633 = vmatpush1.bf16.msra.mxu0 %v3693_v47 }
  0x4b   :  { %2665 = vmatpush1.bf16.msra.mxu1 %v3702_v51  ;;  %2667 = vmatprep.subr.bf16.mxu0 %v3716_v59 }
  0x4c   :  { %2699 = vmatprep.subr.bf16.mxu1 %v3721_v61 }
  0x98   :  { %v328_v14 = vpop.permute.xlu0 %327 }
  0x99   :  { %v338_v28 = vpop.permute.xlu1 %337 }
  0xfc   :  { %v197_v0 = vpop.f32.mrb[0].mxu0 }
  0xfd   :  { %v199_v3 = vpop.f32.mrb[1].mxu0  ;;  %v286_v4 = vpop.f32.mrb[0].mxu1 }
  0xfe   :  { %v309_v6 = vmax.f32 %v197_v0, %v199_v3  ;;  %v288_v7 = vpop.f32.mrb[1].mxu1 }
 0x100   :  { %v313_v15 = vmax.f32 %v309_v6, %v286_v4  ;;  %v203_v16 = vpop.f32.mrb[2].mxu0 }
 0x101   :  { %v205_v18 = vpop.f32.mrb[3].mxu0  ;;  %v292_v20 = vpop.f32.mrb[2].mxu1 }
 0x102   :  { %v317_v23 = vmax.f32 %v313_v15, %v288_v7  ;;  %v310_v25 = vmax.f32 %v203_v16, %v205_v18  ;;  %v294_v27 = vpop.f32.mrb[3].mxu1  ;;  %v386_v7 = vld [vmem:[%s4421_s9 + $0x108] sm:$0xff]  ;;  %v403_v16 = vld [vmem:[%s4421_s9 + $0x190] sm:$0xff] }
 0x103   :  { %v394_v15 = vld [vmem:[%s4421_s9 + $0x148] sm:$0xff] }
 0x104   :  { %v345_v36 = vadd.f32 %v328_v14, %v317_v23  ;;  %v314_v39 = vmax.f32 %v310_v25, %v292_v20  ;;  %v209_v48 = vpop.f32.mrb[4].mxu0  ;;  %v333_v20 = vpop.permute.xlu0 %332  ;;  %v3777_v23 = vpack.c.bf16 %v387_v44, %v378_v43  ;;  %v396_v25 = vld [vmem:[%s4421_s9 + $0x158] sm:$0xff]  ;;  %v3793_v42 = vpack.c.bf16 %v403_v16, %v394_v15  ;;  %v393_v43 = vld [vmem:[%s4421_s9 + $0x140] sm:$0xff]  ;;  %v402_v44 = vld [vmem:[%s4421_s9 + $0x188] sm:$0xff] }
 0x105   :  { %v211_v0 = vpop.f32.mrb[5].mxu0  ;;  %v298_v3 = vpop.f32.mrb[4].mxu1  ;;  %v421_v16 = vld [vmem:[%s4421_s9 + $0x220] sm:$0xff] }
 0x106   :  { %v3764_v4 = vmax.f32 %v345_v36, 0.0  ;;  %v318_v6 = vmax.f32 %v314_v39, %v294_v27  ;;  %v311_v14 = vmax.f32 %v209_v48, %v211_v0  ;;  %v300_v18 = vpop.f32.mrb[5].mxu1  ;;  %v405_v27 = vld [vmem:[%s4421_s9 + $0x1a0] sm:$0xff]  ;;  %v3791_v39 = vpack.c.bf16 %v386_v7, %v377_v60  ;;  %v404_v60 = vld [vmem:[%s4421_s9 + $0x198] sm:$0xff] }
 0x107   :  { %v3805_v55 = vpack.c.bf16 %v405_v27, %v396_v25 }
 0x108   :  { %v346_v31 = vadd.f32 %v333_v20, %v318_v6  ;;  %562 = vmatmul.mubr.f32.vlgmr.msra.gmra.mrb[8].mxu0 %v3764_v4  ;;  %651 = vmatmul.mubr.f32.vlgmr.msra.gmra.mrb[8].mxu1 %v3764_v4  ;;  %v315_v32 = vmax.f32 %v311_v14, %v298_v3  ;;  %v215_v36 = vpop.f32.mrb[6].mxu0  ;;  %v412_v14 = vld [vmem:[%s4421_s9 + $0x1d8] sm:$0xff]  ;;  %v414_v20 = vld [vmem:[%s4421_s9 + $0x1e8] sm:$0xff] }
 0x109   :  { %2669 = vmatpush1.bf16.msra.mxu0 %v3751_v50  ;;  %2701 = vmatpush1.bf16.msra.mxu1 %v3753_v52  ;;  %v217_v48 = vpop.f32.mrb[7].mxu0  ;;  %v304_v0 = vpop.f32.mrb[6].mxu1 }
 0x10a   :  { %v3801_v3 = vmax.f32 %v346_v31, 0.0  ;;  %567 = vmatprep.mubr.f32.mxu0 %v4429_v63  ;;  %656 = vmatprep.mubr.f32.mxu1 %v4429_v63  ;;  %v312_v6 = vmax.f32 %v215_v36, %v217_v48  ;;  %v319_v7 = vmax.f32 %v315_v32, %v300_v18  ;;  %v306_v15 = vpop.f32.mrb[7].mxu1  ;;  %v423_v18 = vld [vmem:[%s4421_s9 + $0x230] sm:$0xff]  ;;  %v3831_v31 = vpack.c.bf16 %v402_v44, %v393_v43  ;;  %v420_v48 = vld [vmem:[%s4421_s9 + $0x218] sm:$0xff]  ;;  %v413_v44 = vld [vmem:[%s4421_s9 + $0x1e0] sm:$0xff] }
 0x10b   :  { %2671 = vmatprep.subr.bf16.mxu0 %v3775_v22  ;;  %2703 = vmatprep.subr.bf16.mxu1 %v3777_v23  ;;  %v3833_v32 = vpack.c.bf16 %v404_v60, %v395_v57  ;;  %v411_v36 = vld [vmem:[%s4421_s9 + $0x1d0] sm:$0xff]  ;;  %v3847_v43 = vpack.c.bf16 %v423_v18, %v414_v20  ;;  %v422_v57 = vld [vmem:[%s4421_s9 + $0x228] sm:$0xff] }
 0x10c   :  { %568 = vmatmul.mubr.f32.gmra.mrb[10].mxu0 %v3801_v3  ;;  %657 = vmatmul.mubr.f32.gmra.mrb[10].mxu1 %v3801_v3  ;;  %v347_v25 = vadd.f32 %v338_v28, %v319_v7  ;;  %v316_v27 = vmax.f32 %v312_v6, %v304_v0  ;;  %4463 = vst [vmem:[#allocation2_spill] sm:$0xff] %v3831_v31  ;;  %v430_v6 = vld [vmem:[%s4421_s9 + $0x268] sm:$0xff]  ;;  %v343_v7 = vpop.permute.xlu1 %342 }
 0x10d   :  { %2673 = vmatpush1.bf16.msra.mxu0 %v3789_v35  ;;  %2705 = vmatpush1.bf16.msra.mxu1 %v3791_v39  ;;  %4464 = vst [vmem:[#allocation3_spill] sm:$0xff] %v3833_v32  ;;  %v3845_v0 = vpack.c.bf16 %v421_v16, %v412_v14  ;;  %4466 = vst [vmem:[#allocation5_spill] sm:$0xff] %v3847_v43  ;;  %v439_v14 = vld [vmem:[%s4421_s9 + $0x2b0] sm:$0xff]  ;;  %v432_v16 = vld [vmem:[%s4421_s9 + $0x278] sm:$0xff]  ;;  %v3873_v18 = vpack.c.bf16 %v420_v48, %v411_v36 }
 0x10e   :  { %2675 = vmatprep.subr.bf16.mxu0 %v3793_v42  ;;  %2707 = vmatprep.subr.bf16.mxu1 %v3805_v55  ;;  %v3843_v28 = vmax.f32 %v347_v25, 0.0  ;;  %v320_v60 = vmax.f32 %v316_v27, %v306_v15  ;;  %v441_v15 = vld [vmem:[%s4421_s9 + $0x2c0] sm:$0xff]  ;;  %v3875_v25 = vpack.c.bf16 %v422_v57, %v413_v44  ;;  %v431_v48 = vld [vmem:[%s4421_s9 + $0x270] sm:$0xff]  ;;  %v440_v44 = vld [vmem:[%s4421_s9 + $0x2b8] sm:$0xff] }
 0x10f   :  { %4465 = vst [vmem:[#allocation4_spill] sm:$0xff] %v3845_v0  ;;  %573 = vmatprep.mubr.f32.mxu0 %v4429_v63  ;;  %662 = vmatprep.mubr.f32.mxu1 %v4429_v63  ;;  %4467 = vst [vmem:[#allocation6_spill] sm:$0xff] %v3873_v18  ;;  %v429_v27 = vld [vmem:[%s4421_s9 + $0x260] sm:$0xff]  ;;  %v3887_v63 = vpack.c.bf16 %v439_v14, %v430_v6  ;;  %v3889_v36 = vpack.c.bf16 %v441_v15, %v432_v16  ;;  %v448_v57 = vld [vmem:[%s4421_s9 + $0x2f8] sm:$0xff] }
 0x110   :  { %v348_v20 = vadd.f32 %v343_v7, %v320_v60  ;;  %574 = vmatmul.mubr.f32.gmra.mrb[12].mxu0 %v3843_v28  ;;  %663 = vmatmul.mubr.f32.gmra.mrb[12].mxu1 %v3843_v28  ;;  %4468 = vst [vmem:[#allocation7_spill] sm:$0xff] %v3875_v25  ;;  %v438_v60 = vld [vmem:[%s4421_s9 + $0x2a8] sm:$0xff]  ;;  %v457_v6 = vld [vmem:[%s4421_s9 + $0x340] sm:$0xff]  ;;  %v459_v16 = vld [vmem:[%s4421_s9 + $0x350] sm:$0xff] }
 0x111   :  { %2677 = vmatpush1.bf16.msra.mxu0 %v3831_v31  ;;  %2709 = vmatpush1.bf16.msra.mxu1 %v3833_v32  ;;  %4469 = vst [vmem:[#allocation8_spill] sm:$0xff] %v3887_v63  ;;  %4470 = vst [vmem:[#allocation9_spill] sm:$0xff] %v3889_v36  ;;  %v450_v14 = vld [vmem:[%s4421_s9 + $0x308] sm:$0xff]  ;;  %v3915_v15 = vpack.c.bf16 %v438_v60, %v429_v27  ;;  %v456_v32 = vld [vmem:[%s4421_s9 + $0x338] sm:$0xff]  ;;  %v3927_v31 = vpack.c.bf16 %v457_v6, %v448_v57 }
 0x112   :  { %2679 = vmatprep.subr.bf16.mxu0 %v3845_v0  ;;  %2711 = vmatprep.subr.bf16.mxu1 %v3847_v43  ;;  %v3885_v7 = vmax.f32 %v348_v20, 0.0  ;;  %v4471_v0 = vmov 0.0   ;;  %v3917_v20 = vpack.c.bf16 %v440_v44, %v431_v48  ;;  %v447_v43 = vld [vmem:[%s4421_s9 + $0x2f0] sm:$0xff]  ;;  %v449_v27 = vld [vmem:[%s4421_s9 + $0x300] sm:$0xff]  ;;  %v458_v60 = vld [vmem:[%s4421_s9 + $0x348] sm:$0xff] }
 0x113   :  { %579 = vmatprep.mubr.f32.mxu0 %v4471_v0  ;;  %668 = vmatprep.mubr.f32.mxu1 %v4471_v0  ;;  %4472 = vst [vmem:[#allocation10_spill] sm:$0xff] %v3915_v15  ;;  %4474 = vst [vmem:[#allocation12_spill] sm:$0xff] %v3927_v31  ;;  %v466_v48 = vld [vmem:[%s4421_s9 + $0x388] sm:$0xff]  ;;  %v475_v44 = vld [vmem:[%s4421_s9 + $0x3d0] sm:$0xff] }
 0x114   :  { %580 = vmatmul.mubr.f32.gmra.mrb[14].mxu0 %v3885_v7  ;;  %669 = vmatmul.mubr.f32.gmra.mrb[14].mxu1 %v3885_v7  ;;  %4473 = vst [vmem:[#allocation11_spill] sm:$0xff] %v3917_v20  ;;  %v468_v57 = vld [vmem:[%s4421_s9 + $0x398] sm:$0xff]  ;;  %v477_v6 = vld [vmem:[%s4421_s9 + $0x3e0] sm:$0xff] }
 0x115   :  { %2681 = vmatpush1.bf16.msra.mxu0 %v3873_v18  ;;  %2713 = vmatpush1.bf16.msra.mxu1 %v3875_v25  ;;  %v3929_v18 = vpack.c.bf16 %v459_v16, %v450_v14  ;;  %v3953_v14 = vpack.c.bf16 %v456_v32, %v447_v43  ;;  %v3955_v16 = vpack.c.bf16 %v458_v60, %v449_v27  ;;  %v467_v32 = vld [vmem:[%s4421_s9 + $0x390] sm:$0xff]  ;;  %v476_v43 = vld [vmem:[%s4421_s9 + $0x3d8] sm:$0xff]  ;;  %v493_v60 = vld [vmem:[%s4421_s9 + $0x460] sm:$0xff] }
 0x116   :  { %2683 = vmatprep.subr.bf16.mxu0 %v3887_v63  ;;  %2715 = vmatprep.subr.bf16.mxu1 %v3889_v36  ;;  %v465_v36 = vld [vmem:[%s4421_s9 + $0x380] sm:$0xff]  ;;  %v474_v63 = vld [vmem:[%s4421_s9 + $0x3c8] sm:$0xff]  ;;  %v3965_v25 = vpack.c.bf16 %v475_v44, %v466_v48  ;;  %v484_v27 = vld [vmem:[%s4421_s9 + $0x418] sm:$0xff] }
 0x117   :  { %4475 = vst [vmem:[#allocation13_spill] sm:$0xff] %v3929_v18  ;;  %739 = vmatprep.mubr.f32.mxu0 %v4471_v0  ;;  %828 = vmatprep.mubr.f32.mxu1 %v4471_v0  ;;  %4476 = vst [vmem:[#allocation14_spill] sm:$0xff] %v3955_v16  ;;  %v486_v48 = vld [vmem:[%s4421_s9 + $0x428] sm:$0xff]  ;;  %v495_v44 = vld [vmem:[%s4421_s9 + $0x470] sm:$0xff] }
 0x119   :  { %2685 = vmatpush1.bf16.msra.mxu0 %v3915_v15  ;;  %2717 = vmatpush1.bf16.msra.mxu1 %v3917_v20  ;;  %v3967_v15 = vpack.c.bf16 %v477_v6, %v468_v57  ;;  %v3989_v57 = vpack.c.bf16 %v474_v63, %v465_v36  ;;  %v3991_v6 = vpack.c.bf16 %v476_v43, %v467_v32  ;;  %v485_v63 = vld [vmem:[%s4421_s9 + $0x420] sm:$0xff]  ;;  %v494_v36 = vld [vmem:[%s4421_s9 + $0x468] sm:$0xff] }
 0x11a   :  { %2687 = vmatprep.subr.bf16.mxu0 %v3927_v31  ;;  %2719 = vmatprep.subr.bf16.mxu1 %v3929_v18  ;;  %v483_v18 = vld [vmem:[%s4421_s9 + $0x410] sm:$0xff]  ;;  %v3998_v31 = vpack.c.bf16 %v493_v60, %v484_v27  ;;  %v4000_v20 = vpack.c.bf16 %v495_v44, %v486_v48  ;;  %v361_v32 = vld [vmem:[%s4421_s9 + $0x40] sm:$0xff]  ;;  %v370_v43 = vld [vmem:[%s4421_s9 + $0x88] sm:$0xff]  ;;  %v4021_v60 = vpack.c.bf16 %v494_v36, %v485_v63 }
 0x11b   :  { %4477 = vst [vmem:[#allocation15_spill] sm:$0xff] %v3989_v57  ;;  %v4025_v48 = vpack.c.bf16 %v370_v43, %v361_v32  ;;  %v379_v44 = vld [vmem:[%s4421_s9 + $0xd0] sm:$0xff]  ;;  %v406_v63 = vld [vmem:[%s4421_s9 + $0x1a8] sm:$0xff]  ;;  %v424_v32 = vld [vmem:[%s4421_s9 + $0x238] sm:$0xff] }
 0x11c   :  { %4479 = vst [vmem:[#allocation17_spill] sm:$0xff] %v4021_v60  ;;  %v415_v36 = vld [vmem:[%s4421_s9 + $0x1f0] sm:$0xff] }
 0x11d   :  { %2689 = vmatpush1.bf16.msra.mxu0 %v3953_v14  ;;  %2721 = vmatpush1.bf16.msra.mxu1 %v3955_v16  ;;  %v492_v16 = vld [vmem:[%s4421_s9 + $0x458] sm:$0xff]  ;;  %4480 = vst [vmem:[#allocation18_spill] sm:$0xff] %v4025_v48  ;;  %v4064_v43 = vpack.c.bf16 %v424_v32, %v415_v36  ;;  %v451_v36 = vld [vmem:[%s4421_s9 + $0x310] sm:$0xff] }
 0x11e   :  { %2691 = vmatprep.subr.bf16.mxu0 %v3965_v25  ;;  %2723 = vmatprep.subr.bf16.mxu1 %v3967_v15  ;;  %v4019_v27 = vpack.c.bf16 %v492_v16, %v483_v18  ;;  %v397_v16 = vld [vmem:[%s4421_s9 + $0x160] sm:$0xff]  ;;  %v460_v32 = vld [vmem:[%s4421_s9 + $0x358] sm:$0xff] }
 0x11f   :  { %4483 = vst [vmem:[#allocation21_spill] sm:$0xff] %v4064_v43 }
 0x120   :  { %4478 = vst [vmem:[#allocation16_spill] sm:$0xff] %v4019_v27 }
 0x121   :  { %2693 = vmatpush1.bf16.msra.mxu0 %v3989_v57  ;;  %2725 = vmatpush1.bf16.msra.mxu1 %v3991_v6  ;;  %v388_v57 = vld [vmem:[%s4421_s9 + $0x118] sm:$0xff] }
 0x122   :  { %2695 = vmatprep.subr.bf16.mxu0 %v3998_v31  ;;  %2727 = vmatprep.subr.bf16.mxu1 %v4000_v20  ;;  %v4036_v18 = vpack.c.bf16 %v388_v57, %v379_v44  ;;  %v4050_v57 = vpack.c.bf16 %v406_v63, %v397_v16  ;;  %v433_v44 = vld [vmem:[%s4421_s9 + $0x280] sm:$0xff]  ;;  %v442_v16 = vld [vmem:[%s4421_s9 + $0x2c8] sm:$0xff] }
 0x123   :  { %v4078_v63 = vpack.c.bf16 %v442_v16, %v433_v44  ;;  %v4091_v44 = vpack.c.bf16 %v460_v32, %v451_v36  ;;  %v469_v16 = vld [vmem:[%s4421_s9 + $0x3a0] sm:$0xff]  ;;  %v496_v36 = vld [vmem:[%s4421_s9 + $0x478] sm:$0xff] }
 0x124   :  { %4481 = vst [vmem:[#allocation19_spill] sm:$0xff] %v4036_v18  ;;  %4482 = vst [vmem:[#allocation20_spill] sm:$0xff] %v4050_v57 }
 0x125   :  { %2697 = vmatpush1.bf16.msra.mxu0 %v4019_v27  ;;  %2729 = vmatpush1.bf16.msra.mxu1 %v4021_v60  ;;  %4484 = vst [vmem:[#allocation22_spill] sm:$0xff] %v4078_v63  ;;  %4485 = vst [vmem:[#allocation23_spill] sm:$0xff] %v4091_v44 }
 0x126   :  { %2731 = vmatprep.subr.bf16.mxu0 %v4025_v48 }
 0x128   :  { %740 = vmatmul.mubr.f32.vlgmr.msra.gmra.mrb[16].mxu0 %v3764_v4  ;;  %829 = vmatmul.mubr.f32.vlgmr.msra.gmra.mrb[16].mxu1 %v3764_v4 }
 0x129   :  { %2733 = vmatpush3.bf16.msra.mxu0 %v4025_v48  ;;  %745 = vmatprep.mubr.f32.mxu0 %v4471_v0 }
 0x12a   :  { %834 = vmatprep.mubr.f32.mxu1 %v4471_v0  ;;  %2735 = vmatprep.subr.bf16.mxu0 %v4036_v18 }
 0x12c   :  { %746 = vmatmul.mubr.f32.gmra.mrb[18].mxu0 %v3801_v3  ;;  %835 = vmatmul.mubr.f32.gmra.mrb[18].mxu1 %v3801_v3 }
 0x12d   :  { %2737 = vmatpush3.bf16.msra.mxu0 %v4036_v18  ;;  %751 = vmatprep.mubr.f32.mxu0 %v4471_v0 }
 0x12e   :  { %840 = vmatprep.mubr.f32.mxu1 %v4471_v0  ;;  %2739 = vmatprep.subr.bf16.mxu0 %v4050_v57 }
 0x130   :  { %752 = vmatmul.mubr.f32.gmra.mrb[20].mxu0 %v3843_v28  ;;  %841 = vmatmul.mubr.f32.gmra.mrb[20].mxu1 %v3843_v28 }
 0x131   :  { %2741 = vmatpush3.bf16.msra.mxu0 %v4050_v57  ;;  %757 = vmatprep.mubr.f32.mxu0 %v4471_v0  ;;  %v478_v57 = vld [vmem:[%s4421_s9 + $0x3e8] sm:$0xff] }
 0x132   :  { %846 = vmatprep.mubr.f32.mxu1 %v4471_v0  ;;  %2743 = vmatprep.subr.bf16.mxu0 %v4064_v43  ;;  %v4101_v18 = vpack.c.bf16 %v478_v57, %v469_v16 }
 0x134   :  { %758 = vmatmul.mubr.f32.gmra.mrb[22].mxu0 %v3885_v7  ;;  %847 = vmatmul.mubr.f32.gmra.mrb[22].mxu1 %v3885_v7  ;;  %4486 = vst [vmem:[#allocation24_spill] sm:$0xff] %v4101_v18 }
 0x135   :  { %2745 = vmatpush3.bf16.msra.mxu0 %v4064_v43  ;;  %2389 = vmatprep.mubr.f32.mxu0 %v3764_v4  ;;  %v487_v4 = vld [vmem:[%s4421_s9 + $0x430] sm:$0xff] }
 0x136   :  { %2747 = vmatprep.subr.bf16.mxu0 %v4078_v63  ;;  %v4111_v32 = vpack.c.bf16 %v496_v36, %v487_v4 }
 0x138   :  { %4487 = vst [vmem:[#allocation25_spill] sm:$0xff] %v4111_v32 }
 0x139   :  { %2749 = vmatpush3.bf16.msra.mxu0 %v4078_v63 }
 0x13a   :  { %2751 = vmatprep.subr.bf16.mxu0 %v4091_v44 }
 0x13d   :  { %2753 = vmatpush3.bf16.msra.mxu0 %v4091_v44 }
 0x13e   :  { %2755 = vmatprep.subr.bf16.mxu0 %v4101_v18 }
 0x141   :  { %2757 = vmatpush3.bf16.msra.mxu0 %v4101_v18 }
 0x142   :  { %2759 = vmatprep.subr.bf16.mxu0 %v4111_v32 }
 0x145   :  { %2761 = vmatpush3.bf16.msra.mxu0 %v4111_v32 }
 0x146   :  { %2835 = vmatprep.subr.bf16.mxu0 %v3370_v56  ;;  %v939_v56 = vld [vmem:[%s4424_s3 + $0x8] sm:$0xff] }
 0x147   :  { %1051 = vmatprep.mubr.f32.mxu1 %v939_v56 }
 0x148   :  { %2390 = vmatmul.mubr.f32.vlgmr.msra.gmra.mrb[24].mxu0 %v3801_v3 }
 0x149   :  { %2392 = vmatprep.mubr.f32.mxu0 %v3843_v28  ;;  %2837 = vmatpush1.bf16.msra.mxu0 %v3400_v2 }
 0x14a   :  { %2839 = vmatprep.subr.bf16.mxu0 %v3432_v12 }
 0x14c   :  { %2393 = vmatmul.mubr.f32.gmra.mrb[26].mxu0 %v3885_v7 }
 0x14d   :  { %2841 = vmatpush1.bf16.msra.mxu0 %v3476_v26  ;;  %1314 = vmatprep.mubr.f32.mxu0 %v4471_v0 }
 0x14e   :  { %2843 = vmatprep.subr.bf16.mxu0 %v3510_v37 }
 0x151   :  { %2845 = vmatpush1.bf16.msra.mxu0 %v3521_v41 }
 0x152   :  { %2847 = vmatprep.subr.bf16.mxu0 %v3544_v49 }
 0x155   :  { %2849 = vmatpush1.bf16.msra.mxu0 %v3566_v58 }
 0x156   :  { %2851 = vmatprep.subr.bf16.mxu0 %v3593_v5 }
 0x159   :  { %2853 = vmatpush1.bf16.msra.mxu0 %v3605_v9 }
 0x15a   :  { %2855 = vmatprep.subr.bf16.mxu0 %v3610_v13 }
 0x15d   :  { %2857 = vmatpush1.bf16.msra.mxu0 %v3631_v19 }
 0x15e   :  { %2859 = vmatprep.subr.bf16.mxu0 %v3655_v29 }
 0x161   :  { %2861 = vmatpush1.bf16.msra.mxu0 %v3666_v33 }
 0x162   :  { %2863 = vmatprep.subr.bf16.mxu0 %v3691_v46 }
 0x165   :  { %2865 = vmatpush1.bf16.msra.mxu0 %v3702_v51 }
 0x166   :  { %2899 = vmatprep.subr.bf16.mxu0 %v3721_v61 }
 0x1db   :  { %v563_v2 = vpop.f32.mrb[8].mxu0  ;;  %v652_v12 = vpop.f32.mrb[8].mxu1 }
 0x1dc   :  { %v565_v26 = vpop.f32.mrb[9].mxu0  ;;  %v654_v37 = vpop.f32.mrb[9].mxu1 }
 0x1df   :  { %v569_v41 = vpop.f32.mrb[10].mxu0  ;;  %v658_v49 = vpop.f32.mrb[10].mxu1 }
 0x1e0   :  { %v2764_v58 = vpack.c.bf16 %v569_v41, %v563_v2  ;;  %v2780_v5 = vpack.c.bf16 %v658_v49, %v652_v12  ;;  %v571_v9 = vpop.f32.mrb[11].mxu0  ;;  %v660_v13 = vpop.f32.mrb[11].mxu1 }
 0x1e1   :  { %v2772_v19 = vpack.c.bf16 %v571_v9, %v565_v26  ;;  %v2788_v29 = vpack.c.bf16 %v660_v13, %v654_v37 }
 0x1e3   :  { %v575_v33 = vpop.f32.mrb[12].mxu0  ;;  %v664_v46 = vpop.f32.mrb[12].mxu1 }
 0x1e4   :  { %v577_v51 = vpop.f32.mrb[13].mxu0  ;;  %v666_v61 = vpop.f32.mrb[13].mxu1 }
 0x1e7   :  { %v581_v3 = vpop.f32.mrb[14].mxu0  ;;  %v670_v28 = vpop.f32.mrb[14].mxu1 }
 0x1e8   :  { %v2768_v7 = vpack.c.bf16 %v581_v3, %v575_v33  ;;  %v2784_v57 = vpack.c.bf16 %v670_v28, %v664_v46  ;;  %v583_v16 = vpop.f32.mrb[15].mxu0  ;;  %v672_v4 = vpop.f32.mrb[15].mxu1 }
 0x1e9   :  { %v2776_v36 = vpack.c.bf16 %v583_v16, %v577_v51  ;;  %v2792_v56 = vpack.c.bf16 %v672_v4, %v666_v61 }
 0x1fb   :  { %v741_v32 = vpop.f32.mrb[16].mxu0  ;;  %v830_v18 = vpop.f32.mrb[16].mxu1 }
 0x1fc   :  { %v743_v2 = vpop.f32.mrb[17].mxu0  ;;  %v832_v12 = vpop.f32.mrb[17].mxu1 }
 0x1ff   :  { %v747_v41 = vpop.f32.mrb[18].mxu0  ;;  %v836_v49 = vpop.f32.mrb[18].mxu1 }
 0x200   :  { %v2762_v26 = vpack.c.bf16 %v747_v41, %v741_v32  ;;  %v2778_v37 = vpack.c.bf16 %v836_v49, %v830_v18  ;;  %v749_v9 = vpop.f32.mrb[19].mxu0  ;;  %v838_v13 = vpop.f32.mrb[19].mxu1 }
 0x201   :  { %v2770_v44 = vpack.c.bf16 %v749_v9, %v743_v2  ;;  %v2786_v63 = vpack.c.bf16 %v838_v13, %v832_v12 }
 0x202   :  { %2763 = vmatprep.subr.bf16.mxu1 %v2762_v26 }
 0x203   :  { %v753_v43 = vpop.f32.mrb[20].mxu0  ;;  %v842_v33 = vpop.f32.mrb[20].mxu1  ;;  %2765 = vmatpush3.bf16.msra.mxu1 %v2764_v58 }
 0x204   :  { %v755_v46 = vpop.f32.mrb[21].mxu0  ;;  %v844_v3 = vpop.f32.mrb[21].mxu1 }
 0x207   :  { %v759_v51 = vpop.f32.mrb[22].mxu0  ;;  %v848_v61 = vpop.f32.mrb[22].mxu1 }
 0x208   :  { %v2766_v28 = vpack.c.bf16 %v759_v51, %v753_v43  ;;  %v2782_v16 = vpack.c.bf16 %v848_v61, %v842_v33  ;;  %v761_v4 = vpop.f32.mrb[23].mxu0  ;;  %v850_v48 = vpop.f32.mrb[23].mxu1 }
 0x209   :  { %v2774_v60 = vpack.c.bf16 %v761_v4, %v755_v46  ;;  %v2790_v27 = vpack.c.bf16 %v850_v48, %v844_v3  ;;  %v938_v48 = vld [vmem:[%s4424_s3] sm:$0xff]  ;;  %v4495_v4 = vld [vmem:[#allocation9_spill] sm:$0xff] }
 0x20a   :  { %2767 = vmatprep.subr.bf16.mxu1 %v2766_v28 }
 0x20b   :  { %2769 = vmatpush3.bf16.msra.mxu1 %v2768_v7  ;;  %v943_v7 = vld [vmem:[%s4424_s3 + $0x28] sm:$0xff] }
 0x20c   :  { %2771 = vmatprep.subr.bf16.mxu1 %v2770_v44  ;;  %v944_v44 = vld [vmem:[%s4424_s3 + $0x30] sm:$0xff] }
 0x20f   :  { %2773 = vmatpush3.bf16.msra.mxu1 %v2772_v19  ;;  %v947_v19 = vld [vmem:[%s4424_s3 + $0x48] sm:$0xff] }
 0x210   :  { %2775 = vmatprep.subr.bf16.mxu1 %v2774_v60  ;;  %v942_v60 = vld [vmem:[%s4424_s3 + $0x20] sm:$0xff] }
 0x213   :  { %2777 = vmatpush3.bf16.msra.mxu1 %v2776_v36 }
 0x214   :  { %2779 = vmatprep.subr.bf16.mxu1 %v2778_v37 }
 0x217   :  { %2781 = vmatpush3.bf16.msra.mxu1 %v2780_v5  ;;  %v948_v5 = vld [vmem:[%s4424_s3 + $0x50] sm:$0xff] }
 0x218   :  { %2783 = vmatprep.subr.bf16.mxu1 %v2782_v16  ;;  %v4494_v16 = vld [vmem:[#allocation8_spill] sm:$0xff] }
 0x21b   :  { %v2391_v18 = vpop.f32.mrb[24].mxu0  ;;  %2785 = vmatpush3.bf16.msra.mxu1 %v2784_v57  ;;  %v949_v57 = vld [vmem:[%s4424_s3 + $0x58] sm:$0xff] }
 0x21c   :  { %v919_v32 = vpop.f32.mrb[25].mxu0  ;;  %2787 = vmatprep.subr.bf16.mxu1 %v2786_v63  ;;  %v941_v63 = vld [vmem:[%s4424_s3 + $0x18] sm:$0xff] }
 0x21d   :  { %v2794_v58 = vpack.c.bf16 %v2391_v18, %v919_v32  ;;  %v4496_v18 = vld [vmem:[#allocation10_spill] sm:$0xff]  ;;  %v4497_v32 = vld [vmem:[#allocation11_spill] sm:$0xff] }
 0x21f   :  { %v2394_v43 = vpop.f32.mrb[26].mxu0  ;;  %2789 = vmatpush3.bf16.msra.mxu1 %v2788_v29  ;;  %v940_v29 = vld [vmem:[%s4424_s3 + $0x10] sm:$0xff] }
 0x220   :  { %v929_v2 = vpop.f32.mrb[27].mxu0  ;;  %2791 = vmatprep.subr.bf16.mxu1 %v2790_v27  ;;  %v945_v27 = vld [vmem:[%s4424_s3 + $0x38] sm:$0xff] }
 0x221   :  { %v2798_v12 = vpack.c.bf16 %v2394_v43, %v929_v2  ;;  %v4499_v43 = vld [vmem:[#allocation13_spill] sm:$0xff]  ;;  %v4500_v2 = vld [vmem:[#allocation14_spill] sm:$0xff] }
 0x223   :  { %2793 = vmatpush3.bf16.msra.mxu1 %v2792_v56 }
 0x224   :  { %2795 = vmatprep.subr.bf16.mxu1 %v2794_v58 }
 0x226   :  { %1052 = vmatmul.mubr.f32.vlgmr.msra.gmra.mrb[24].mxu1 %v938_v48  ;;  %v4502_v48 = vld [vmem:[#allocation16_spill] sm:$0xff] }
 0x227   :  { %2797 = vmatpush3.bf16.msra.mxu1 %v2794_v58  ;;  %1056 = vmatprep.mubr.f32.mxu1 %v942_v60  ;;  %v4498_v58 = vld [vmem:[#allocation12_spill] sm:$0xff]  ;;  %v4503_v60 = vld [vmem:[#allocation17_spill] sm:$0xff] }
 0x228   :  { %2799 = vmatprep.subr.bf16.mxu1 %v2798_v12 }
 0x22a   :  { %1057 = vmatmul.mubr.f32.gmra.mrb[26].mxu1 %v941_v63  ;;  %v4504_v63 = vld [vmem:[#allocation18_spill] sm:$0xff] }
 0x22b   :  { %2801 = vmatpush3.bf16.msra.mxu1 %v2798_v12  ;;  %1061 = vmatprep.mubr.f32.mxu1 %v945_v27  ;;  %v4501_v12 = vld [vmem:[#allocation15_spill] sm:$0xff]  ;;  %v4511_v27 = vld [vmem:[#allocation25_spill] sm:$0xff] }
 0x22c   :  { %2803 = vmatprep.subr.bf16.mxu1 %v3362_v53  ;;  %v946_v53 = vld [vmem:[%s4424_s3 + $0x40] sm:$0xff] }
 0x22e   :  { %1062 = vmatmul.mubr.f32.gmra.mrb[28].mxu1 %v944_v44  ;;  %v1603_v44 = vld [vmem:[%s4425_s5 + $0x8] sm:$0xff] }
 0x22f   :  { %1066 = vmatprep.mubr.f32.mxu1 %v948_v5  ;;  %v1604_v5 = vld [vmem:[%s4425_s5 + $0x10] sm:$0xff] }
 0x232   :  { %1067 = vmatmul.mubr.f32.gmra.mrb[30].mxu1 %v947_v19 }
 0x233   :  { %2403 = vmatprep.mubr.msk.f32.mxu1 %vm974_vm1, %v940_v29 }
 0x236   :  { %2404 = vmatmul.mubr.msk.f32.vlgmr.msra.gmra.mrb[32].mxu1 %vm974_vm1, %v943_v7 }
 0x237   :  { %2406 = vmatprep.mubr.msk.f32.mxu1 %vm974_vm1, %v946_v53  ;;  %2805 = vmatpush1.bf16.msra.mxu1 %v3397_v1 }
 0x238   :  { %2807 = vmatprep.subr.bf16.mxu1 %v3429_v11 }
 0x23a   :  { %2407 = vmatmul.mubr.msk.f32.gmra.mrb[34].mxu1 %vm974_vm1, %v949_v57 }
 0x23b   :  { %2809 = vmatpush1.bf16.msra.mxu1 %v3461_v21  ;;  %1225 = vmatprep.mubr.f32.mxu1 %v4471_v0 }
 0x23c   :  { %2811 = vmatprep.subr.bf16.mxu1 %v3500_v34 }
 0x23f   :  { %2813 = vmatpush1.bf16.msra.mxu1 %v3512_v38 }
 0x240   :  { %2815 = vmatprep.subr.bf16.mxu1 %v3532_v45 }
 0x243   :  { %2817 = vmatpush1.bf16.msra.mxu1 %v3557_v54 }
 0x244   :  { %2819 = vmatprep.subr.bf16.mxu1 %v3578_v62 }
 0x247   :  { %2821 = vmatpush1.bf16.msra.mxu1 %v3602_v8 }
 0x248   :  { %2823 = vmatprep.subr.bf16.mxu1 %v3607_v10  ;;  %v962_v10 = vpop.permute.xlu1 %961 }
 0x24b   :  { %2825 = vmatpush1.bf16.msra.mxu1 %v3626_v17 }
 0x24c   :  { %2827 = vmatprep.subr.bf16.mxu1 %v3644_v24  ;;  %v957_v24 = vpop.permute.xlu0 %956 }
 0x24f   :  { %2829 = vmatpush1.bf16.msra.mxu1 %v3657_v30 }
 0x250   :  { %2831 = vmatprep.subr.bf16.mxu1 %v3680_v40  ;;  %v967_v37 = vpop.permute.xlu0 %966 }
 0x253   :  { %2833 = vmatpush1.bf16.msra.mxu1 %v3693_v47 }
 0x254   :  { %2867 = vmatprep.subr.bf16.mxu1 %v3716_v59  ;;  %v972_v59 = vpop.permute.xlu1 %971 }
 0x2f9   :  { %v2216_v1 = vpop.f32.mrb[24].mxu1 }
 0x2fa   :  { %v2217_v11 = vpop.f32.mrb[25].mxu1 }
 0x2fb   :  { %v2218_v21 = vadd.f32 %v2217_v11, %v2216_v1 }
 0x2fd   :  { %v2219_v34 = vpop.f32.mrb[26].mxu1  ;;  %v1054_v41 = vadd.f32 %v2218_v21, %v957_v24 }
 0x2fe   :  { %v2220_v38 = vpop.f32.mrb[27].mxu1 }
 0x2ff   :  { %v2221_v45 = vadd.f32 %v2220_v38, %v2219_v34 }
 0x301   :  { %v2222_v54 = vpop.f32.mrb[28].mxu1  ;;  %v1059_v56 = vadd.f32 %v2221_v45, %v962_v10 }
 0x302   :  { %v2223_v62 = vpop.f32.mrb[29].mxu1 }
 0x303   :  { %v2224_v8 = vadd.f32 %v2223_v62, %v2222_v54 }
 0x305   :  { %v2225_v17 = vpop.f32.mrb[30].mxu1  ;;  %v1064_v46 = vadd.f32 %v2224_v8, %v967_v37 }
 0x306   :  { %v2226_v36 = vpop.f32.mrb[31].mxu1 }
 0x307   :  { %v2227_v30 = vadd.f32 %v2226_v36, %v2225_v17 }
 0x309   :  { %v2405_v40 = vpop.f32.mrb[32].mxu1  ;;  %v1069_v9 = vadd.f32 %v2227_v30, %v972_v59 }
 0x30a   :  { %v1144_v47 = vadd.f32 %v2405_v40, %v1059_v56  ;;  %v1138_v49 = vpop.f32.mrb[33].mxu1 }
 0x30b   :  { %v1139_v26 = vadd.f32 %v1138_v49, %v1054_v41 }
 0x30c   :  { %v4201_v28 = vmax.f32 %v1144_v47, 0.0 }
 0x30d   :  { %v4195_v13 = vmax.f32 %v1139_v26, 0.0  ;;  %v2408_v33 = vpop.f32.mrb[34].mxu1 }
 0x30e   :  { %v1154_v3 = vadd.f32 %v2408_v33, %v1069_v9  ;;  %v1148_v51 = vpop.f32.mrb[35].mxu1 }
 0x30f   :  { %v1149_v61 = vadd.f32 %v1148_v51, %v1064_v46  ;;  %1226 = vmatmul.mubr.f32.vlgmr.msra.gmra.mrb[36].mxu1 %v4195_v13  ;;  %1315 = vmatmul.mubr.f32.vlgmr.msra.gmra.mrb[28].mxu0 %v4195_v13 }
 0x310   :  { %2869 = vmatpush1.bf16.msra.mxu1 %v3751_v50  ;;  %2901 = vmatpush1.bf16.msra.mxu0 %v3753_v52  ;;  %v4488_v52 = vld [vmem:[#allocation2_spill] sm:$0xff] }
 0x311   :  { %1231 = vmatprep.mubr.f32.mxu1 %v4471_v0  ;;  %1320 = vmatprep.mubr.f32.mxu0 %v4471_v0  ;;  %v4211_v50 = vmax.f32 %v1149_v61, 0.0 }
 0x312   :  { %2871 = vmatprep.subr.bf16.mxu1 %v3775_v22  ;;  %2903 = vmatprep.subr.bf16.mxu0 %v3777_v23  ;;  %v4489_v22 = vld [vmem:[#allocation3_spill] sm:$0xff]  ;;  %v1160_v23 = vmax.f32 %v1154_v3, 0.0 }
 0x313   :  { %1232 = vmatmul.mubr.f32.gmra.mrb[38].mxu1 %v4201_v28  ;;  %1321 = vmatmul.mubr.f32.gmra.mrb[30].mxu0 %v4201_v28 }
 0x314   :  { %2873 = vmatpush1.bf16.msra.mxu1 %v3789_v35  ;;  %2905 = vmatpush1.bf16.msra.mxu0 %v3791_v39  ;;  %v4490_v35 = vld [vmem:[#allocation4_spill] sm:$0xff]  ;;  %v4491_v39 = vld [vmem:[#allocation5_spill] sm:$0xff] }
 0x315   :  { %1237 = vmatprep.mubr.f32.mxu1 %v4471_v0  ;;  %1326 = vmatprep.mubr.f32.mxu0 %v4471_v0 }
 0x316   :  { %2875 = vmatprep.subr.bf16.mxu1 %v3793_v42  ;;  %2907 = vmatprep.subr.bf16.mxu0 %v3805_v55  ;;  %v4492_v42 = vld [vmem:[#allocation6_spill] sm:$0xff]  ;;  %v4493_v55 = vld [vmem:[#allocation7_spill] sm:$0xff] }
 0x317   :  { %1238 = vmatmul.mubr.f32.gmra.mrb[40].mxu1 %v4211_v50  ;;  %1327 = vmatmul.mubr.f32.gmra.mrb[32].mxu0 %v4211_v50 }
 0x318   :  { %2877 = vmatpush1.bf16.msra.mxu1 %v4488_v52  ;;  %2909 = vmatpush1.bf16.msra.mxu0 %v4489_v22 }
 0x319   :  { %1243 = vmatprep.mubr.f32.mxu1 %v4471_v0  ;;  %1332 = vmatprep.mubr.f32.mxu0 %v4471_v0 }
 0x31a   :  { %2879 = vmatprep.subr.bf16.mxu1 %v4490_v35  ;;  %2911 = vmatprep.subr.bf16.mxu0 %v4491_v39 }
 0x31b   :  { %1244 = vmatmul.mubr.f32.gmra.mrb[42].mxu1 %v1160_v23  ;;  %1333 = vmatmul.mubr.f32.gmra.mrb[34].mxu0 %v1160_v23 }
 0x31c   :  { %2881 = vmatpush1.bf16.msra.mxu1 %v4492_v42  ;;  %2913 = vmatpush1.bf16.msra.mxu0 %v4493_v55 }
 0x31d   :  { %2883 = vmatprep.subr.bf16.mxu1 %v4494_v16  ;;  %2915 = vmatprep.subr.bf16.mxu0 %v4495_v4 }
 0x31e   :  { %1403 = vmatprep.mubr.f32.mxu1 %v4471_v0  ;;  %1492 = vmatprep.mubr.f32.mxu0 %v4471_v0 }
 0x320   :  { %2885 = vmatpush1.bf16.msra.mxu1 %v4496_v18  ;;  %2917 = vmatpush1.bf16.msra.mxu0 %v4497_v32 }
 0x321   :  { %2887 = vmatprep.subr.bf16.mxu1 %v4498_v58  ;;  %2919 = vmatprep.subr.bf16.mxu0 %v4499_v43 }
 0x324   :  { %2889 = vmatpush1.bf16.msra.mxu1 %v3953_v14  ;;  %2921 = vmatpush1.bf16.msra.mxu0 %v4500_v2  ;;  %v4509_v14 = vld [vmem:[#allocation23_spill] sm:$0xff] }
 0x325   :  { %2891 = vmatprep.subr.bf16.mxu1 %v3965_v25  ;;  %2923 = vmatprep.subr.bf16.mxu0 %v3967_v15  ;;  %v4505_v25 = vld [vmem:[#allocation19_spill] sm:$0xff]  ;;  %v4507_v15 = vld [vmem:[#allocation21_spill] sm:$0xff] }
 0x328   :  { %2893 = vmatpush1.bf16.msra.mxu1 %v4501_v12  ;;  %2925 = vmatpush1.bf16.msra.mxu0 %v3991_v6  ;;  %v4510_v6 = vld [vmem:[#allocation24_spill] sm:$0xff] }
 0x329   :  { %2895 = vmatprep.subr.bf16.mxu1 %v3998_v31  ;;  %2927 = vmatprep.subr.bf16.mxu0 %v4000_v20  ;;  %v4506_v31 = vld [vmem:[#allocation20_spill] sm:$0xff]  ;;  %v4508_v20 = vld [vmem:[#allocation22_spill] sm:$0xff] }
 0x32c   :  { %2897 = vmatpush1.bf16.msra.mxu1 %v4502_v48  ;;  %2929 = vmatpush1.bf16.msra.mxu0 %v4503_v60  ;;  %v1916_v48 = vld [vmem:[%s4426_s10] sm:$0xff]  ;;  %v1917_v60 = vld [vmem:[%s4426_s10 + $0x8] sm:$0xff] }
 0x32d   :  { %2931 = vmatprep.subr.bf16.mxu1 %v4504_v63 }
 0x32f   :  { %1404 = vmatmul.mubr.f32.vlgmr.msra.gmra.mrb[44].mxu1 %v4195_v13  ;;  %1493 = vmatmul.mubr.f32.vlgmr.msra.gmra.mrb[36].mxu0 %v4195_v13 }
 0x330   :  { %2933 = vmatpush3.bf16.msra.mxu1 %v4504_v63  ;;  %1409 = vmatprep.mubr.f32.mxu1 %v4471_v0 }
 0x331   :  { %1498 = vmatprep.mubr.f32.mxu0 %v4471_v0  ;;  %2935 = vmatprep.subr.bf16.mxu1 %v4505_v25 }
 0x333   :  { %1410 = vmatmul.mubr.f32.gmra.mrb[46].mxu1 %v4201_v28  ;;  %1499 = vmatmul.mubr.f32.gmra.mrb[38].mxu0 %v4201_v28 }
 0x334   :  { %2937 = vmatpush3.bf16.msra.mxu1 %v4505_v25  ;;  %1415 = vmatprep.mubr.f32.mxu1 %v4471_v0 }
 0x335   :  { %1504 = vmatprep.mubr.f32.mxu0 %v4471_v0  ;;  %2939 = vmatprep.subr.bf16.mxu1 %v4506_v31 }
 0x337   :  { %1416 = vmatmul.mubr.f32.gmra.mrb[48].mxu1 %v4211_v50  ;;  %1505 = vmatmul.mubr.f32.gmra.mrb[40].mxu0 %v4211_v50 }
 0x338   :  { %2941 = vmatpush3.bf16.msra.mxu1 %v4506_v31  ;;  %1421 = vmatprep.mubr.f32.mxu1 %v4471_v0  ;;  %v3002_v31 = vpack.c.bf16 %v1917_v60, %v1916_v48 }
 0x339   :  { %1510 = vmatprep.mubr.f32.mxu0 %v4471_v0  ;;  %2943 = vmatprep.subr.bf16.mxu1 %v4507_v15 }
 0x33b   :  { %1422 = vmatmul.mubr.f32.gmra.mrb[50].mxu1 %v1160_v23  ;;  %1511 = vmatmul.mubr.f32.gmra.mrb[42].mxu0 %v1160_v23 }
 0x33c   :  { %2945 = vmatpush3.bf16.msra.mxu1 %v4507_v15  ;;  %2441 = vmatprep.mubr.f32.mxu1 %v4195_v13 }
 0x33d   :  { %2947 = vmatprep.subr.bf16.mxu1 %v4508_v20  ;;  %1762 = vmatprep.mubr.f32.mxu0 %v1603_v44  ;;  %v1607_v44 = vld [vmem:[%s4425_s5 + $0x28] sm:$0xff] }
 0x340   :  { %2949 = vmatpush3.bf16.msra.mxu1 %v4508_v20  ;;  %v1918_v20 = vld [vmem:[%s4426_s10 + $0x10] sm:$0xff] }
 0x341   :  { %2951 = vmatprep.subr.bf16.mxu1 %v4509_v14 }
 0x344   :  { %2953 = vmatpush3.bf16.msra.mxu1 %v4509_v14  ;;  %v1919_v14 = vld [vmem:[%s4426_s10 + $0x18] sm:$0xff] }
 0x345   :  { %2955 = vmatprep.subr.bf16.mxu1 %v4510_v6 }
 0x348   :  { %2957 = vmatpush3.bf16.msra.mxu1 %v4510_v6  ;;  %v1602_v6 = vld [vmem:[%s4425_s5] sm:$0xff] }
 0x349   :  { %2959 = vmatprep.subr.bf16.mxu1 %v4511_v27 }
 0x34c   :  { %2961 = vmatpush3.bf16.msra.mxu1 %v4511_v27  ;;  %v1606_v27 = vld [vmem:[%s4425_s5 + $0x20] sm:$0xff] }
 0x34f   :  { %2442 = vmatmul.mubr.f32.vlgmr.msra.gmra.mrb[52].mxu1 %v4201_v28 }
 0x350   :  { %2444 = vmatprep.mubr.f32.mxu1 %v4211_v50 }
 0x353   :  { %2445 = vmatmul.mubr.f32.gmra.mrb[54].mxu1 %v1160_v23 }
 0x354   :  { %2455 = vmatprep.mubr.msk.f32.mxu1 %vm974_vm1, %v1604_v5  ;;  %v1610_v5 = vld [vmem:[%s4425_s5 + $0x40] sm:$0xff] }
 0x3e2   :  { %v1227_v19 = vpop.f32.mrb[36].mxu1  ;;  %v1316_v29 = vpop.f32.mrb[28].mxu0 }
 0x3e3   :  { %v1229_v7 = vpop.f32.mrb[37].mxu1  ;;  %v4283_v53 = vpop.f32.mrb[29].mxu0 }
 0x3e6   :  { %v1233_v57 = vpop.f32.mrb[38].mxu1  ;;  %v1322_v1 = vpop.f32.mrb[30].mxu0 }
 0x3e7   :  { %v2964_v11 = vpack.c.bf16 %v1233_v57, %v1227_v19  ;;  %v2980_v21 = vpack.c.bf16 %v1322_v1, %v1316_v29  ;;  %v1235_v34 = vpop.f32.mrb[39].mxu1  ;;  %v1324_v38 = vpop.f32.mrb[31].mxu0  ;;  %v3006_v19 = vpack.c.bf16 %v1919_v14, %v1918_v20  ;;  %v1920_v29 = vld [vmem:[%s4426_s10 + $0x20] sm:$0xff]  ;;  %v1609_v57 = vld [vmem:[%s4425_s5 + $0x38] sm:$0xff] }
 0x3e8   :  { %v2972_v45 = vpack.c.bf16 %v1235_v34, %v1229_v7  ;;  %v2988_v54 = vpack.c.bf16 %v1324_v38, %v4283_v53  ;;  %v1921_v7 = vld [vmem:[%s4426_s10 + $0x28] sm:$0xff]  ;;  %v1605_v53 = vld [vmem:[%s4425_s5 + $0x18] sm:$0xff]  ;;  %v1922_v34 = vld [vmem:[%s4426_s10 + $0x30] sm:$0xff] }
 0x3e9   :  { %v1613_v1 = vld [vmem:[%s4425_s5 + $0x58] sm:$0xff] }
 0x3ea   :  { %v1239_v62 = vpop.f32.mrb[40].mxu1  ;;  %v1328_v8 = vpop.f32.mrb[32].mxu0  ;;  %v1923_v38 = vld [vmem:[%s4426_s10 + $0x38] sm:$0xff] }
 0x3eb   :  { %v1241_v10 = vpop.f32.mrb[41].mxu1  ;;  %v1330_v17 = vpop.f32.mrb[33].mxu0 }
 0x3ee   :  { %v1245_v24 = vpop.f32.mrb[42].mxu1  ;;  %v1334_v36 = vpop.f32.mrb[34].mxu0 }
 0x3ef   :  { %v2968_v30 = vpack.c.bf16 %v1245_v24, %v1239_v62  ;;  %v2984_v56 = vpack.c.bf16 %v1334_v36, %v1328_v8  ;;  %v1247_v40 = vpop.f32.mrb[43].mxu1  ;;  %v1336_v41 = vpop.f32.mrb[35].mxu0  ;;  %v1619_v62 = vld [vmem:[%s4425_s5 + $0x88] sm:$0xff]  ;;  %v1622_v8 = vld [vmem:[%s4425_s5 + $0xa0] sm:$0xff] }
 0x3f0   :  { %v2976_v47 = vpack.c.bf16 %v1247_v40, %v1241_v10  ;;  %v2992_v49 = vpack.c.bf16 %v1336_v41, %v1330_v17  ;;  %v3014_v10 = vpack.c.bf16 %v1923_v38, %v1922_v34  ;;  %v1924_v17 = vld [vmem:[%s4426_s10 + $0x40] sm:$0xff]  ;;  %v1925_v24 = vld [vmem:[%s4426_s10 + $0x48] sm:$0xff] }
 0x3f1   :  { %v1611_v36 = vld [vmem:[%s4425_s5 + $0x48] sm:$0xff]  ;;  %v3018_v40 = vpack.c.bf16 %v1925_v24, %v1924_v17  ;;  %v1614_v41 = vld [vmem:[%s4425_s5 + $0x60] sm:$0xff] }
 0x402   :  { %v1405_v59 = vpop.f32.mrb[44].mxu1  ;;  %v1494_v26 = vpop.f32.mrb[36].mxu0 }
 0x403   :  { %v1407_v37 = vpop.f32.mrb[45].mxu1  ;;  %v1496_v9 = vpop.f32.mrb[37].mxu0 }
 0x406   :  { %v1411_v13 = vpop.f32.mrb[46].mxu1  ;;  %v1500_v33 = vpop.f32.mrb[38].mxu0 }
 0x407   :  { %v2962_v46 = vpack.c.bf16 %v1411_v13, %v1405_v59  ;;  %v2978_v3 = vpack.c.bf16 %v1500_v33, %v1494_v26  ;;  %v1413_v51 = vpop.f32.mrb[47].mxu1  ;;  %v1502_v61 = vpop.f32.mrb[39].mxu0  ;;  %v1621_v59 = vld [vmem:[%s4425_s5 + $0x98] sm:$0xff]  ;;  %v1620_v26 = vld [vmem:[%s4425_s5 + $0x90] sm:$0xff] }
 0x408   :  { %v2970_v28 = vpack.c.bf16 %v1413_v51, %v1407_v37  ;;  %v2986_v50 = vpack.c.bf16 %v1502_v61, %v1496_v9  ;;  %v1624_v37 = vld [vmem:[%s4425_s5 + $0xb0] sm:$0xff]  ;;  %v1623_v9 = vld [vmem:[%s4425_s5 + $0xa8] sm:$0xff]  ;;  %v1927_v33 = vld [vmem:[%s4426_s10 + $0x58] sm:$0xff] }
 0x409   :  { %2963 = vmatprep.subr.bf16.mxu0 %v2962_v46  ;;  %v1926_v13 = vld [vmem:[%s4426_s10 + $0x50] sm:$0xff]  ;;  %v1929_v51 = vld [vmem:[%s4426_s10 + $0x68] sm:$0xff] }
 0x40a   :  { %v1417_v52 = vpop.f32.mrb[48].mxu1  ;;  %v1506_v22 = vpop.f32.mrb[40].mxu0  ;;  %2965 = vmatpush3.bf16.msra.mxu0 %v2964_v11  ;;  %v1616_v11 = vld [vmem:[%s4425_s5 + $0x70] sm:$0xff]  ;;  %v3022_v46 = vpack.c.bf16 %v1927_v33, %v1926_v13 }
 0x40b   :  { %v1419_v23 = vpop.f32.mrb[49].mxu1  ;;  %v1508_v35 = vpop.f32.mrb[41].mxu0 }
 0x40e   :  { %v1423_v39 = vpop.f32.mrb[50].mxu1  ;;  %v1512_v42 = vpop.f32.mrb[42].mxu0 }
 0x40f   :  { %v2966_v55 = vpack.c.bf16 %v1423_v39, %v1417_v52  ;;  %v2982_v16 = vpack.c.bf16 %v1512_v42, %v1506_v22  ;;  %v1425_v4 = vpop.f32.mrb[51].mxu1  ;;  %v1514_v18 = vpop.f32.mrb[43].mxu0 }
 0x410   :  { %v2974_v32 = vpack.c.bf16 %v1425_v4, %v1419_v23  ;;  %v2990_v58 = vpack.c.bf16 %v1514_v18, %v1508_v35 }
 0x411   :  { %2967 = vmatprep.subr.bf16.mxu0 %v2966_v55  ;;  %v1637_v55 = vpop.permute.xlu0 %1636 }
 0x412   :  { %2969 = vmatpush3.bf16.msra.mxu0 %v2968_v30  ;;  %v1615_v30 = vld [vmem:[%s4425_s5 + $0x68] sm:$0xff] }
 0x413   :  { %2971 = vmatprep.subr.bf16.mxu0 %v2970_v28  ;;  %v1930_v28 = vld [vmem:[%s4426_s10 + $0x70] sm:$0xff] }
 0x416   :  { %2973 = vmatpush3.bf16.msra.mxu0 %v2972_v45  ;;  %v1608_v45 = vld [vmem:[%s4425_s5 + $0x30] sm:$0xff] }
 0x417   :  { %2975 = vmatprep.subr.bf16.mxu0 %v2974_v32 }
 0x41a   :  { %2977 = vmatpush3.bf16.msra.mxu0 %v2976_v47  ;;  %v1618_v47 = vld [vmem:[%s4425_s5 + $0x80] sm:$0xff] }
 0x41b   :  { %2979 = vmatprep.subr.bf16.mxu0 %v2978_v3  ;;  %v1928_v3 = vld [vmem:[%s4426_s10 + $0x60] sm:$0xff] }
 0x41c   :  { %v3026_v61 = vpack.c.bf16 %v1929_v51, %v1928_v3 }
 0x41e   :  { %2981 = vmatpush3.bf16.msra.mxu0 %v2980_v21  ;;  %v3010_v21 = vpack.c.bf16 %v1921_v7, %v1920_v29 }
 0x41f   :  { %2983 = vmatprep.subr.bf16.mxu0 %v2982_v16 }
 0x422   :  { %v2443_v43 = vpop.f32.mrb[52].mxu1  ;;  %2985 = vmatpush3.bf16.msra.mxu0 %v2984_v56  ;;  %v1625_v56 = vld [vmem:[%s4425_s5 + $0xb8] sm:$0xff] }
 0x423   :  { %v1583_v2 = vpop.f32.mrb[53].mxu1  ;;  %2987 = vmatprep.subr.bf16.mxu0 %v2986_v50  ;;  %v1931_v50 = vld [vmem:[%s4426_s10 + $0x78] sm:$0xff] }
 0x424   :  { %v2994_v12 = vpack.c.bf16 %v2443_v43, %v1583_v2  ;;  %v3030_v52 = vpack.c.bf16 %v1931_v50, %v1930_v28 }
 0x426   :  { %v2446_v63 = vpop.f32.mrb[54].mxu1  ;;  %2989 = vmatpush3.bf16.msra.mxu0 %v2988_v54  ;;  %2995 = vmatprep.subr.bf16.mxu1 %v2994_v12  ;;  %v1612_v54 = vld [vmem:[%s4425_s5 + $0x50] sm:$0xff] }
 0x427   :  { %v1593_v25 = vpop.f32.mrb[55].mxu1  ;;  %2991 = vmatprep.subr.bf16.mxu0 %v2990_v58  ;;  %2997 = vmatpush3.bf16.msra.mxu1 %v2994_v12  ;;  %v1642_v12 = vpop.permute.xlu1 %1641 }
 0x428   :  { %v2998_v15 = vpack.c.bf16 %v2446_v63, %v1593_v25 }
 0x42a   :  { %2993 = vmatpush3.bf16.msra.mxu0 %v2992_v49  ;;  %2999 = vmatprep.subr.bf16.mxu1 %v2998_v15  ;;  %v1617_v49 = vld [vmem:[%s4425_s5 + $0x78] sm:$0xff] }
 0x42b   :  { %3001 = vmatpush3.bf16.msra.mxu1 %v2998_v15  ;;  %3003 = vmatprep.subr.bf16.mxu0 %v3002_v31 }
 0x42d   :  { %1763 = vmatmul.mubr.f32.vlgmr.msra.gmra.mrb[44].mxu0 %v1602_v6  ;;  %v1647_v6 = vpop.permute.xlu0 %1646 }
 0x42e   :  { %1767 = vmatprep.mubr.f32.mxu0 %v1606_v27  ;;  %2456 = vmatmul.mubr.msk.f32.vlgmr.msra.gmra.mrb[56].mxu1 %vm974_vm1, %v1607_v44 }
 0x42f   :  { %2458 = vmatprep.mubr.msk.f32.mxu1 %vm974_vm1, %v1610_v5  ;;  %3005 = vmatpush3.bf16.msra.mxu0 %v3002_v31 }
 0x430   :  { %3007 = vmatprep.subr.bf16.mxu0 %v3006_v19 }
 0x431   :  { %1768 = vmatmul.mubr.f32.gmra.mrb[46].mxu0 %v1605_v53 }
 0x432   :  { %1772 = vmatprep.mubr.f32.mxu0 %v1609_v57  ;;  %2459 = vmatmul.mubr.msk.f32.gmra.mrb[58].mxu1 %vm974_vm1, %v1613_v1  ;;  %v1652_v1 = vpop.permute.xlu1 %1651 }
 0x433   :  { %2461 = vmatprep.mubr.msk.f32.mxu1 %vm974_vm1, %v1616_v11  ;;  %3009 = vmatpush3.bf16.msra.mxu0 %v3006_v19 }
 0x434   :  { %3011 = vmatprep.subr.bf16.mxu0 %v3010_v21 }
 0x435   :  { %1773 = vmatmul.mubr.f32.gmra.mrb[48].mxu0 %v1608_v45 }
 0x436   :  { %1777 = vmatprep.mubr.f32.mxu0 %v1612_v54  ;;  %2462 = vmatmul.mubr.msk.f32.gmra.mrb[60].mxu1 %vm974_vm1, %v1619_v62  ;;  %v1657_v62 = vpop.permute.xlu0 %1656 }
 0x437   :  { %2464 = vmatprep.mubr.msk.f32.mxu1 %vm974_vm1, %v1622_v8  ;;  %3013 = vmatpush3.bf16.msra.mxu0 %v3010_v21 }
 0x438   :  { %3015 = vmatprep.subr.bf16.mxu0 %v3014_v10 }
 0x439   :  { %1778 = vmatmul.mubr.f32.gmra.mrb[50].mxu0 %v1611_v36 }
 0x43a   :  { %1782 = vmatprep.mubr.f32.mxu0 %v1615_v30  ;;  %2465 = vmatmul.mubr.msk.f32.gmra.mrb[62].mxu1 %vm974_vm1, %v1625_v56  ;;  %v1662_v56 = vpop.permute.xlu1 %1661 }
 0x43b   :  { %3017 = vmatpush3.bf16.msra.mxu0 %v3014_v10  ;;  %2527 = vmatprep.mubr.msk.f32.mxu1 %vm3059_vm2, %v4471_v0  ;;  %v2037_v0 = vld [vmem:[%s4427_s7] sm:$0x3] }
 0x43c   :  { %3019 = vmatprep.subr.bf16.mxu0 %v3018_v40 }
 0x43d   :  { %1783 = vmatmul.mubr.f32.gmra.mrb[52].mxu0 %v1614_v41 }
 0x43e   :  { %1787 = vmatprep.mubr.f32.mxu0 %v1618_v47 }
 0x43f   :  { %3021 = vmatpush3.bf16.msra.mxu0 %v3018_v40 }
 0x440   :  { %3023 = vmatprep.subr.bf16.mxu0 %v3022_v46 }
 0x441   :  { %1788 = vmatmul.mubr.f32.gmra.mrb[54].mxu0 %v1617_v49 }
 0x442   :  { %1792 = vmatprep.mubr.f32.mxu0 %v1621_v59 }
 0x443   :  { %3025 = vmatpush3.bf16.msra.mxu0 %v3022_v46 }
 0x444   :  { %3027 = vmatprep.subr.bf16.mxu0 %v3026_v61 }
 0x445   :  { %1793 = vmatmul.mubr.f32.gmra.mrb[56].mxu0 %v1620_v26 }
 0x446   :  { %1797 = vmatprep.mubr.f32.mxu0 %v1624_v37  ;;  %v1667_v37 = vpop.permute.xlu0 %1666 }
 0x447   :  { %3029 = vmatpush3.bf16.msra.mxu0 %v3026_v61  ;;  %v1672_v61 = vpop.permute.xlu1 %1671 }
 0x448   :  { %3031 = vmatprep.subr.bf16.mxu0 %v3030_v52 }
 0x449   :  { %1798 = vmatmul.mubr.f32.gmra.mrb[58].mxu0 %v1623_v9 }
 0x44b   :  { %3033 = vmatpush3.bf16.msra.mxu0 %v3030_v52 }
 0x500   :  { %v2288_v22 = vpop.f32.mrb[44].mxu0 }
 0x501   :  { %v2289_v23 = vpop.f32.mrb[45].mxu0  ;;  %v2457_v35 = vpop.f32.mrb[56].mxu1 }
 0x502   :  { %v2290_v39 = vadd.f32 %v2289_v23, %v2288_v22  ;;  %v1869_v42 = vpop.f32.mrb[57].mxu1  ;;  %v3058_v23 = vmov 0.0|0.0  }
 0x503   :  { %3034 = vmatprep.subr.bf16.mxu1 %v3058_v23 }
 0x504   :  { %v2291_v16 = vpop.f32.mrb[46].mxu0  ;;  %v1765_v4 = vadd.f32 %v2290_v39, %v1637_v55 }
 0x505   :  { %v2292_v18 = vpop.f32.mrb[47].mxu0  ;;  %v2460_v32 = vpop.f32.mrb[58].mxu1 }
 0x506   :  { %v2293_v58 = vadd.f32 %v2292_v18, %v2291_v16  ;;  %v1870_v43 = vadd.f32 %v1869_v42, %v1765_v4  ;;  %v1879_v2 = vpop.f32.mrb[59].mxu1 }
 0x508   :  { %v1770_v48 = vadd.f32 %v2293_v58, %v1642_v12  ;;  %v1908_v60 = vmax.f32 %v1870_v43, 0.0  ;;  %v2294_v63 = vpop.f32.mrb[48].mxu0 }
 0x509   :  { %v2295_v25 = vpop.f32.mrb[49].mxu0  ;;  %v2463_v31 = vpop.f32.mrb[60].mxu1 }
 0x50a   :  { %v1875_v15 = vadd.f32 %v2457_v35, %v1770_v48  ;;  %v2296_v20 = vadd.f32 %v2295_v25, %v2294_v63  ;;  %2499 = vmatprep.mubr.f32.mxu0 %v1908_v60  ;;  %v1889_v14 = vpop.f32.mrb[61].mxu1  ;;  %v2042_v48 = vpop.permute.xlu0 %2041 }
 0x50c   :  { %v1909_v27 = vmax.f32 %v1875_v15, 0.0  ;;  %v2297_v44 = vpop.f32.mrb[50].mxu0  ;;  %v1775_v5 = vadd.f32 %v2296_v20, %v1647_v6 }
 0x50d   :  { %v2298_v19 = vpop.f32.mrb[51].mxu0  ;;  %v2466_v29 = vpop.f32.mrb[62].mxu1 }
 0x50e   :  { %v2299_v7 = vadd.f32 %v2298_v19, %v2297_v44  ;;  %v1880_v53 = vadd.f32 %v1879_v2, %v1775_v5  ;;  %2500 = vmatmul.mubr.f32.vlgmr.msra.gmra.mrb[60].mxu0 %v1909_v27  ;;  %v1899_v57 = vpop.f32.mrb[63].mxu1 }
 0x510   :  { %v1780_v11 = vadd.f32 %v2299_v7, %v1652_v1  ;;  %v1910_v21 = vmax.f32 %v1880_v53, 0.0  ;;  %v2300_v34 = vpop.f32.mrb[52].mxu0 }
 0x511   :  { %v2301_v38 = vpop.f32.mrb[53].mxu0 }
 0x512   :  { %v2302_v45 = vadd.f32 %v2301_v38, %v2300_v34  ;;  %2502 = vmatprep.mubr.f32.mxu0 %v1910_v21  ;;  %v1885_v54 = vadd.f32 %v2460_v32, %v1780_v11 }
 0x514   :  { %v2303_v8 = vpop.f32.mrb[54].mxu0  ;;  %v1785_v10 = vadd.f32 %v2302_v45, %v1657_v62  ;;  %v1911_v17 = vmax.f32 %v1885_v54, 0.0 }
 0x515   :  { %v2304_v24 = vpop.f32.mrb[55].mxu0 }
 0x516   :  { %v2305_v36 = vadd.f32 %v2304_v24, %v2303_v8  ;;  %v1890_v30 = vadd.f32 %v1889_v14, %v1785_v10  ;;  %2503 = vmatmul.mubr.f32.gmra.mrb[62].mxu0 %v1911_v17 }
 0x518   :  { %v1790_v40 = vadd.f32 %v2305_v36, %v1662_v56  ;;  %v1912_v41 = vmax.f32 %v1890_v30, 0.0  ;;  %v2306_v47 = vpop.f32.mrb[56].mxu0 }
 0x519   :  { %v2307_v49 = vpop.f32.mrb[57].mxu0 }
 0x51a   :  { %v2308_v59 = vadd.f32 %v2307_v49, %v2306_v47  ;;  %2505 = vmatprep.mubr.f32.mxu0 %v1912_v41  ;;  %v1895_v26 = vadd.f32 %v2463_v31, %v1790_v40 }
 0x51c   :  { %v2309_v9 = vpop.f32.mrb[58].mxu0  ;;  %v1795_v13 = vadd.f32 %v2308_v59, %v1667_v37  ;;  %v1913_v33 = vmax.f32 %v1895_v26, 0.0 }
 0x51d   :  { %v2310_v46 = vpop.f32.mrb[59].mxu0 }
 0x51e   :  { %v2311_v3 = vadd.f32 %v2310_v46, %v2309_v9  ;;  %v1900_v51 = vadd.f32 %v1899_v57, %v1795_v13  ;;  %2506 = vmatmul.mubr.f32.gmra.mrb[64].mxu0 %v1913_v33 }
 0x520   :  { %v1800_v28 = vadd.f32 %v2311_v3, %v1672_v61  ;;  %v1914_v50 = vmax.f32 %v1900_v51, 0.0 }
 0x522   :  { %2508 = vmatprep.mubr.f32.mxu0 %v1914_v50  ;;  %v1905_v52 = vadd.f32 %v2466_v29, %v1800_v28 }
 0x524   :  { %v1915_v22 = vmax.f32 %v1905_v52, 0.0 }
 0x526   :  { %2509 = vmatmul.mubr.f32.gmra.mrb[66].mxu0 %v1915_v22 }
 0x5e1   :  { %v2501_v35 = vpop.f32.mrb[60].mxu0 }
 0x5e2   :  { %v1998_v39 = vpop.f32.mrb[61].mxu0 }
 0x5e3   :  { %v3035_v42 = vpack.c.bf16 %v2501_v35, %v1998_v39 }
 0x5e5   :  { %3036 = vmatpush3.bf16.msra.mxu1 %v3035_v42 }
 0x5e6   :  { %3037 = vmatprep.subr.bf16.mxu1 %v3058_v23 }
 0x5e9   :  { %v2504_v55 = vpop.f32.mrb[62].mxu0 }
 0x5ea   :  { %v2008_v16 = vpop.f32.mrb[63].mxu0 }
 0x5eb   :  { %v3038_v4 = vpack.c.bf16 %v2504_v55, %v2008_v16 }
 0x5ed   :  { %3039 = vmatpush3.bf16.msra.mxu1 %v3038_v4 }
 0x5ee   :  { %3040 = vmatprep.subr.bf16.mxu1 %v3058_v23 }
 0x5f1   :  { %v2507_v18 = vpop.f32.mrb[64].mxu0 }
 0x5f2   :  { %v2018_v32 = vpop.f32.mrb[65].mxu0 }
 0x5f3   :  { %v3041_v58 = vpack.c.bf16 %v2507_v18, %v2018_v32 }
 0x5f5   :  { %3042 = vmatpush3.bf16.msra.mxu1 %v3041_v58 }
 0x5f6   :  { %3043 = vmatprep.subr.bf16.mxu1 %v3058_v23 }
 0x5f9   :  { %v2510_v43 = vpop.f32.mrb[66].mxu0 }
 0x5fa   :  { %v2028_v2 = vpop.f32.mrb[67].mxu0 }
 0x5fb   :  { %v3044_v12 = vpack.c.bf16 %v2510_v43, %v2028_v2 }
 0x5fd   :  { %3045 = vmatpush3.bf16.msra.mxu1 %v3044_v12 }
 0x600   :  { %2528 = vmatmul.mubr.msk.f32.vlgmr.msra.gmra.mrb[64].mxu1 %vm2044_vm3, %v2037_v0 }
 0x6d3   :  { %v2114_v60 = vpop.f32.mrb[64].mxu1 }
 0x6d4   :  { %v2115_v63 = vadd.f32 %v2114_v60, %v2042_v48  ;;  %v2529_v25 = vpop.f32.mrb[65].mxu1 }
 0x6d6   :  { %v2119_v31 = vsel %vm2118_vm4, %v2115_v63, -inf }
 0x6d7   :  { %v2120_v15 = vrot.slane %v2119_v31, 4 }
 0x6d9   :  { %v2121_v20 = vmax.f32 %v2119_v31, %v2120_v15 }
 0x6db   :  { %v2122_v14 = vrot.slane %v2121_v20, 2 }
 0x6dd   :  { %v2123_v6 = vmax.f32 %v2121_v20, %v2122_v14 }
 0x6df   :  { %v2124_v27 = vrot.slane %v2123_v6, 1 }
 0x6e1   :  { %v2125_v44 = vmax.f32 %v2123_v6, %v2124_v27 }
 0x6e3   :  { %v2126_v5 = vsub.f32 %v2115_v63, %v2125_v44 }
 0x6e5   :  { %v2127_v19 = vmul.f32 1.442695, %v2126_v5 }
 0x6e7   :  { %3052 = vpow2.f32 %v2127_v19 }
 0x6f1   :  { %v3053_v29 = vpop.eup %3052 }
 0x6f2   :  { %v2129_v7 = vsel %vm2118_vm4, %v3053_v29, 0.0 }
 0x6f3   :  { %v2130_v53 = vrot.slane %v2129_v7, 4 }
 0x6f5   :  { %v2131_v57 = vadd.f32 %v2130_v53, %v2129_v7 }
 0x6f7   :  { %v2132_v1 = vrot.slane %v2131_v57, 2 }
 0x6f9   :  { %v2133_v11 = vadd.f32 %v2132_v1, %v2131_v57 }
 0x6fb   :  { %v2134_v21 = vrot.slane %v2133_v11, 1 }
 0x6fd   :  { %v2135_v34 = vadd.f32 %v2134_v21, %v2133_v11 }
 0x6ff   :  { %3054 = vrcp.f32 %v2135_v34 }
 0x709   :  { %v3055_v38 = vpop.eup %3054 }
 0x70a   :  { %v2137_v45 = vmul.f32 %v3055_v38, %v3053_v29 }
 0x70c   :  { %2138 = vst.msk [vmem:[%s4428_s11] sm:$0x3] %vm2118_vm4, %v2137_v45 }

</bundles_post_ra>
